<compile_context>
chip_gen: v7x
topology: tpu7x:2x2x1
jax: 0.10.0
libtpu: 0.0.40
codegen_flags: <defaults>
</compile_context>

<pallas_src>
import functools

import jax
import jax.numpy as jnp
from jax import lax
from jax.experimental import pallas as pl
from jax.experimental.pallas import tpu as pltpu

NUM_GROUPS = 8
EPS = 1e-5


def _conv_block_kernel(x_ref, w1_ref, w2_ref, wid_ref, mgrp_ref,
                       g1_ref, b1_ref, g2_ref, b2_ref, masks_ref, o_ref,
                       *, W, Bblk, mxu_dtype):
    """One block of Bblk samples per grid step.

    x_ref:     (Bblk, Cin,  HW)   input samples, CHW-flat (lane dim = HW)
    w1_ref:    (9, Cout, Cin)     conv1 taps, tap-major (ky*3+kx)
    w2_ref:    (9, Cout, Cout)    conv2 taps
    wid_ref:   (Cout, Cin)        1x1 identity conv
    mgrp_ref:  (Cout, Cout)       same-group matrix scaled by 1/(cg*HW)
    g*/b*_ref: (Cout, 1)          GroupNorm affine params (f32)
    masks_ref: (9, HW)            border-validity masks per 3x3 tap
    o_ref:     (Bblk, Cout, HW)   output samples (lane-dense store)
    """
    HW = o_ref.shape[2]

    masks = masks_ref[...]                  # (9, HW), mxu_dtype {0,1}
    mgrp = mgrp_ref[...]                    # (Cout, Cout) f32
    g1, b1 = g1_ref[...], b1_ref[...]
    g2, b2 = g2_ref[...], b2_ref[...]
    w1 = w1_ref[...]                        # (9, Cout, Cin)  mxu_dtype
    w2 = w2_ref[...]                        # (9, Cout, Cout) mxu_dtype
    wid = wid_ref[...]                      # (Cout, Cin)     mxu_dtype

    def conv3x3(a, w):
        # a: (C, HW) in mxu_dtype, w: (9, Cout, C).
        # Per-tap accumulating matmuls: no (9C, HW) im2col buffer is ever
        # materialised.  Tap t=(dy+1)*3+(dx+1) fetches spatial neighbour
        # (y+dy, x+dx) via a lane rotation of the flat index; out-of-bounds
        # positions are zeroed by the precomputed mask (zero padding).
        acc = jnp.dot(w[4], a, preferred_element_type=jnp.float32)  # center
        for t in range(9):
            if t == 4:
                continue
            dy, dx = t // 3 - 1, t % 3 - 1
            off = dy * W + dx
            tap = pltpu.roll(a, shift=(-off) % HW, axis=1) * masks[t:t + 1, :]
            acc = acc + jnp.dot(w[t], tap, preferred_element_type=jnp.float32)
        return acc                                                   # (Cout, HW) f32

    def gnorm(y, gamma, beta):
        # Two-pass GroupNorm on (C, HW).  Lane (spatial) reduce first, then a
        # tiny (C,C)@(C,1) group-combine (mgrp already carries 1/(cg*HW)).
        s = jnp.sum(y, axis=1, keepdims=True)                        # (C, 1)
        mean = jnp.dot(mgrp, s, preferred_element_type=jnp.float32)  # (C, 1)
        d = y - mean
        s2 = jnp.sum(d * d, axis=1, keepdims=True)                   # (C, 1)
        var = jnp.dot(mgrp, s2, preferred_element_type=jnp.float32)  # (C, 1)
        inv = lax.rsqrt(var + EPS)
        return d * (inv * gamma) + beta

    for b in range(Bblk):  # static unroll; Bblk is small (<= 8)
        x = x_ref[b].astype(mxu_dtype)                               # (Cin, HW)

        # 1x1 identity conv (separate small matmul, no zero-padded fold).
        ident = jnp.dot(wid, x, preferred_element_type=jnp.float32)  # (Cout, HW)

        # stage 1: relu(GN1(conv1(x)))
        y1 = jnp.maximum(gnorm(conv3x3(x, w1), g1, b1), 0.0)
        # stage 2: relu(GN2(conv2(y1)) + ident)
        y2 = gnorm(conv3x3(y1.astype(mxu_dtype), w2), g2, b2)
        o_ref[b] = jnp.maximum(y2 + ident, 0.0).astype(o_ref.dtype)


def conv_block(x, params, *, num_groups=NUM_GROUPS, mxu_dtype=jnp.bfloat16,
               max_block_batch=8):
    """x: (B, Cin, H, W) NCHW; params in PyTorch layout (OIHW conv weights)."""
    B, Cin, H, W = x.shape
    Cout = params["w1"].shape[0]
    HW = H * W
    cg = Cout // num_groups

    # Batch-block size: largest divisor of B <= max_block_batch.
    # (On v7x prefer a resulting grid extent that is a multiple of 2 so both
    # TensorCores get balanced work -- tune via max_block_batch.)
    Bblk = 1
    for d in range(1, min(B, max_block_batch) + 1):
        if B % d == 0:
            Bblk = d

    # ---- parameter prep (weight-sized, tiny; done once in plain JAX) -----
    # conv taps: (Cout, Cin, 3, 3) -> (3, 3, Cout, Cin) -> (9, Cout, Cin)
    w1t = jnp.transpose(params["w1"], (2, 3, 0, 1)).reshape(9, Cout, Cin)
    w2t = jnp.transpose(params["w2"], (2, 3, 0, 1)).reshape(9, Cout, Cout)
    widm = params["wid"].reshape(Cout, Cin)
    w1t, w2t, widm = (a.astype(mxu_dtype) for a in (w1t, w2t, widm))

    cidx = jnp.arange(Cout)
    same_group = (cidx[:, None] // cg) == (cidx[None, :] // cg)
    mgrp = same_group.astype(jnp.float32) / float(cg * HW)           # (Cout, Cout)

    p = jnp.arange(HW)
    py, px = p // W, p % W
    mask_list = []
    for t in range(9):
        dy, dx = t // 3 - 1, t % 3 - 1
        valid = (py + dy >= 0) & (py + dy < H) & (px + dx >= 0) & (px + dx < W)
        mask_list.append(valid)
    masks = jnp.stack(mask_list).astype(mxu_dtype)                   # (9, HW)

    g1 = params["gamma1"].reshape(Cout, 1).astype(jnp.float32)
    b1 = params["beta1"].reshape(Cout, 1).astype(jnp.float32)
    g2 = params["gamma2"].reshape(Cout, 1).astype(jnp.float32)
    b2 = params["beta2"].reshape(Cout, 1).astype(jnp.float32)

    # NCHW -> (B, C, H*W): contiguous reshape, no transpose / HBM relayout.
    x_flat = x.reshape(B, Cin, HW)
    out_dtype = x.dtype  # follow the caller's activation dtype

    # VMEM budget from the actual footprint (double-buffered I/O blocks +
    # params + per-sample live intermediates), with headroom.
    isz_x = jnp.dtype(x.dtype).itemsize
    isz_m = jnp.dtype(mxu_dtype).itemsize
    in_block = Bblk * Cin * HW * isz_x
    out_block = Bblk * Cout * HW * isz_x
    param_bytes = ((w1t.size + w2t.size + widm.size + masks.size) * isz_m
                   + (mgrp.size + 4 * Cout) * 4)
    live_bytes = 8 * Cout * HW * 4 + 2 * max(Cin, Cout) * HW * isz_m
    vmem_limit = 2 * (in_block + out_block) + 2 * param_bytes + live_bytes + (8 << 20)
    vmem_limit = int(min(max(vmem_limit, 32 << 20), 64 << 20))

    kernel = functools.partial(_conv_block_kernel, W=W, Bblk=Bblk,
                               mxu_dtype=mxu_dtype)

    out_flat = pl.pallas_call(
        kernel,
        grid=(B // Bblk,),
        in_specs=[
            pl.BlockSpec((Bblk, Cin, HW), lambda nb: (nb, 0, 0)),
            pl.BlockSpec((9, Cout, Cin), lambda nb: (0, 0, 0)),
            pl.BlockSpec((9, Cout, Cout), lambda nb: (0, 0, 0)),
            pl.BlockSpec((Cout, Cin), lambda nb: (0, 0)),
            pl.BlockSpec((Cout, Cout), lambda nb: (0, 0)),
            pl.BlockSpec((Cout, 1), lambda nb: (0, 0)),
            pl.BlockSpec((Cout, 1), lambda nb: (0, 0)),
            pl.BlockSpec((Cout, 1), lambda nb: (0, 0)),
            pl.BlockSpec((Cout, 1), lambda nb: (0, 0)),
            pl.BlockSpec((9, HW), lambda nb: (0, 0)),
        ],
        out_specs=pl.BlockSpec((Bblk, Cout, HW), lambda nb: (nb, 0, 0)),
        out_shape=jax.ShapeDtypeStruct((B, Cout, HW), out_dtype),
        compiler_params=pltpu.CompilerParams(
            dimension_semantics=("parallel",),
            vmem_limit_bytes=vmem_limit),
    )(x_flat, w1t, w2t, widm, mgrp, g1, b1, g2, b2, masks)

    # (B, Cout, H*W) -> NCHW: contiguous reshape, free.
    return out_flat.reshape(B, Cout, H, W)


# -------- pure-JAX reference (for correctness check only) --------
def _ref_group_norm(x, gamma, beta):
    B, C, H, W = x.shape
    cg = C // NUM_GROUPS
    xg = x.reshape(B, NUM_GROUPS, cg, H, W)
    mean = xg.mean(axis=(2, 3, 4), keepdims=True)
    var = ((xg - mean) ** 2).mean(axis=(2, 3, 4), keepdims=True)
    xn = ((xg - mean) * lax.rsqrt(var + EPS)).reshape(B, C, H, W)
    return xn * gamma.reshape(1, C, 1, 1) + beta.reshape(1, C, 1, 1)


def _ref_conv_block(x, params):
    dn = ("NCHW", "OIHW", "NCHW")
    conv = lambda a, w: lax.conv_general_dilated(a, w, (1, 1), "SAME",
                                                 dimension_numbers=dn)
    ident = conv(x, params["wid"])
    out = conv(x, params["w1"])
    out = jnp.maximum(_ref_group_norm(out, params["gamma1"], params["beta1"]), 0.0)
    out = conv(out, params["w2"])
    out = _ref_group_norm(out, params["gamma2"], params["beta2"])
    return jnp.maximum(out + ident, 0.0)


if __name__ == "__main__":
    key = jax.random.PRNGKey(0)
    B, Cin, H, W = 2, 4, 16, 16
    Cout = 16  # must be divisible by num_groups=8

    ks = jax.random.split(key, 4)
    x = jax.random.normal(ks[0], (B, Cin, H, W), jnp.float32)
    params = dict(
        # PyTorch layouts: Conv2d weight (Cout, Cin, kh, kw); GN affine (C,)
        w1=jax.random.normal(ks[1], (Cout, Cin, 3, 3), jnp.float32) * 0.1,
        w2=jax.random.normal(ks[2], (Cout, Cout, 3, 3), jnp.float32) * 0.1,
        wid=jax.random.normal(ks[3], (Cout, Cin, 1, 1), jnp.float32) * 0.1,
        gamma1=jnp.ones((Cout,), jnp.float32),
        beta1=jnp.zeros((Cout,), jnp.float32),
        gamma2=jnp.ones((Cout,), jnp.float32),
        beta2=jnp.zeros((Cout,), jnp.float32),
    )

    ref = _ref_conv_block(x, params)

    # Exact-path check: f32 MXU operands, tight tolerance.
    run_f32 = jax.jit(functools.partial(conv_block, mxu_dtype=jnp.float32))
    out32 = run_f32(x, params)
    jax.block_until_ready(out32)
    assert out32.shape == (B, Cout, H, W)
    assert jnp.allclose(out32, ref, atol=1e-3, rtol=1e-3), "f32 mismatch vs reference"

    # Default path: bf16 MXU operands (f32 accumulation), relaxed tolerance.
    run_bf16 = jax.jit(conv_block)
    out16 = run_bf16(x, params)
    jax.block_until_ready(out16)
    assert out16.shape == (B, Cout, H, W)
    assert jnp.allclose(out16, ref, atol=5e-2, rtol=5e-2), "bf16 mismatch vs reference"

    print("KERNEL_OK")
</pallas_src>

<mosaic_0001>
module attributes {stable_mosaic.version = 11 : i64} {
  func.func @_conv_block_kernel(%arg0: i32, %arg1: memref<2x4x256xf32, #tpu.memory_space<vmem>>, %arg2: memref<9x16x4xf32, #tpu.memory_space<vmem>>, %arg3: memref<9x16x16xf32, #tpu.memory_space<vmem>>, %arg4: memref<16x4xf32, #tpu.memory_space<vmem>>, %arg5: memref<16x16xf32, #tpu.memory_space<vmem>>, %arg6: memref<16x1xf32, #tpu.memory_space<vmem>>, %arg7: memref<16x1xf32, #tpu.memory_space<vmem>>, %arg8: memref<16x1xf32, #tpu.memory_space<vmem>>, %arg9: memref<16x1xf32, #tpu.memory_space<vmem>>, %arg10: memref<9x256xf32, #tpu.memory_space<vmem>>, %arg11: memref<2x16x256xf32, #tpu.memory_space<vmem>>) attributes {dimension_semantics = [#tpu.dimension_semantics<parallel>], iteration_bounds = array<i64: 1>, scalar_prefetch = 0 : i64, scratch_operands = 0 : i64, tpu.core_type = #tpu.core_type<tc>, window_params = [{transform_indices = @transform_0, window_bounds = array<i64: 2, 4, 256>}, {pipeline_mode = #tpu.pipeline_mode<synchronous>, transform_indices = @transform_1, window_bounds = array<i64: 9, 16, 4>}, {pipeline_mode = #tpu.pipeline_mode<synchronous>, transform_indices = @transform_2, window_bounds = array<i64: 9, 16, 16>}, {pipeline_mode = #tpu.pipeline_mode<synchronous>, transform_indices = @transform_3, window_bounds = array<i64: 16, 4>}, {pipeline_mode = #tpu.pipeline_mode<synchronous>, transform_indices = @transform_4, window_bounds = array<i64: 16, 16>}, {pipeline_mode = #tpu.pipeline_mode<synchronous>, transform_indices = @transform_5, window_bounds = array<i64: 16, 1>}, {pipeline_mode = #tpu.pipeline_mode<synchronous>, transform_indices = @transform_6, window_bounds = array<i64: 16, 1>}, {pipeline_mode = #tpu.pipeline_mode<synchronous>, transform_indices = @transform_7, window_bounds = array<i64: 16, 1>}, {pipeline_mode = #tpu.pipeline_mode<synchronous>, transform_indices = @transform_8, window_bounds = array<i64: 16, 1>}, {pipeline_mode = #tpu.pipeline_mode<synchronous>, transform_indices = @transform_9, window_bounds = array<i64: 9, 256>}, {transform_indices = @transform_10, window_bounds = array<i64: 2, 16, 256>}]} {
    %c0 = arith.constant 0 : index
    %c0_0 = arith.constant 0 : index
    %0 = vector.load %arg10[%c0, %c0_0] : memref<9x256xf32, #tpu.memory_space<vmem>>, vector<9x256xf32>
    %c0_1 = arith.constant 0 : index
    %c0_2 = arith.constant 0 : index
    %1 = vector.load %arg5[%c0_1, %c0_2] : memref<16x16xf32, #tpu.memory_space<vmem>>, vector<16x16xf32>
    %c0_3 = arith.constant 0 : index
    %c0_4 = arith.constant 0 : index
    %2 = vector.load %arg6[%c0_3, %c0_4] : memref<16x1xf32, #tpu.memory_space<vmem>>, vector<16x1xf32>
    %c0_5 = arith.constant 0 : index
    %c0_6 = arith.constant 0 : index
    %3 = vector.load %arg7[%c0_5, %c0_6] : memref<16x1xf32, #tpu.memory_space<vmem>>, vector<16x1xf32>
    %c0_7 = arith.constant 0 : index
    %c0_8 = arith.constant 0 : index
    %4 = vector.load %arg8[%c0_7, %c0_8] : memref<16x1xf32, #tpu.memory_space<vmem>>, vector<16x1xf32>
    %c0_9 = arith.constant 0 : index
    %c0_10 = arith.constant 0 : index
    %5 = vector.load %arg9[%c0_9, %c0_10] : memref<16x1xf32, #tpu.memory_space<vmem>>, vector<16x1xf32>
    %c0_11 = arith.constant 0 : index
    %c0_12 = arith.constant 0 : index
    %c0_13 = arith.constant 0 : index
    %6 = vector.load %arg2[%c0_11, %c0_12, %c0_13] : memref<9x16x4xf32, #tpu.memory_space<vmem>>, vector<9x16x4xf32>
    %c0_14 = arith.constant 0 : index
    %c0_15 = arith.constant 0 : index
    %c0_16 = arith.constant 0 : index
    %7 = vector.load %arg3[%c0_14, %c0_15, %c0_16] : memref<9x16x16xf32, #tpu.memory_space<vmem>>, vector<9x16x16xf32>
    %c0_17 = arith.constant 0 : index
    %c0_18 = arith.constant 0 : index
    %8 = vector.load %arg4[%c0_17, %c0_18] : memref<16x4xf32, #tpu.memory_space<vmem>>, vector<16x4xf32>
    %c0_19 = arith.constant 0 : index
    %c0_20 = arith.constant 0 : index
    %c0_21 = arith.constant 0 : index
    %9 = vector.load %arg1[%c0_19, %c0_20, %c0_21] : memref<2x4x256xf32, #tpu.memory_space<vmem>>, vector<1x4x256xf32>
    %10 = vector.shape_cast %9 : vector<1x4x256xf32> to vector<4x256xf32>
    %cst = arith.constant dense<0.000000e+00> : vector<16x256xf32>
    %11 = tpu.matmul %8, %10, %cst {dimension_numbers = #tpu.dot_dimension_numbers<[1], [0], [0], [1], [0, 0, 1, 1], [], []>} : vector<16x4xf32>, vector<4x256xf32>, vector<16x256xf32> -> vector<16x256xf32>
    %12 = vector.extract_strided_slice %6 {offsets = [4, 0, 0], sizes = [1, 16, 4], strides = [1, 1, 1]} : vector<9x16x4xf32> to vector<1x16x4xf32>
    %13 = vector.shape_cast %12 : vector<1x16x4xf32> to vector<16x4xf32>
    %cst_22 = arith.constant dense<0.000000e+00> : vector<16x256xf32>
    %14 = tpu.matmul %13, %10, %cst_22 {dimension_numbers = #tpu.dot_dimension_numbers<[1], [0], [0], [1], [0, 0, 1, 1], [], []>} : vector<16x4xf32>, vector<4x256xf32>, vector<16x256xf32> -> vector<16x256xf32>
    %c17_i32 = arith.constant 17 : i32
    %15 = tpu.dynamic_rotate %10 by %c17_i32 dim 1 : vector<4x256xf32>, i32 -> vector<4x256xf32>
    %16 = vector.extract_strided_slice %0 {offsets = [0, 0], sizes = [1, 256], strides = [1, 1]} : vector<9x256xf32> to vector<1x256xf32>
    %17 = vector.broadcast %16 : vector<1x256xf32> to vector<4x256xf32>
    %18 = arith.mulf %15, %17 : vector<4x256xf32>
    %19 = vector.extract_strided_slice %6 {offsets = [0, 0, 0], sizes = [1, 16, 4], strides = [1, 1, 1]} : vector<9x16x4xf32> to vector<1x16x4xf32>
    %20 = vector.shape_cast %19 : vector<1x16x4xf32> to vector<16x4xf32>
    %cst_23 = arith.constant dense<0.000000e+00> : vector<16x256xf32>
    %21 = tpu.matmul %20, %18, %cst_23 {dimension_numbers = #tpu.dot_dimension_numbers<[1], [0], [0], [1], [0, 0, 1, 1], [], []>} : vector<16x4xf32>, vector<4x256xf32>, vector<16x256xf32> -> vector<16x256xf32>
    %22 = arith.addf %14, %21 : vector<16x256xf32>
    %c16_i32 = arith.constant 16 : i32
    %23 = tpu.dynamic_rotate %10 by %c16_i32 dim 1 : vector<4x256xf32>, i32 -> vector<4x256xf32>
    %24 = vector.extract_strided_slice %0 {offsets = [1, 0], sizes = [1, 256], strides = [1, 1]} : vector<9x256xf32> to vector<1x256xf32>
    %25 = vector.broadcast %24 : vector<1x256xf32> to vector<4x256xf32>
    %26 = arith.mulf %23, %25 : vector<4x256xf32>
    %27 = vector.extract_strided_slice %6 {offsets = [1, 0, 0], sizes = [1, 16, 4], strides = [1, 1, 1]} : vector<9x16x4xf32> to vector<1x16x4xf32>
    %28 = vector.shape_cast %27 : vector<1x16x4xf32> to vector<16x4xf32>
    %cst_24 = arith.constant dense<0.000000e+00> : vector<16x256xf32>
    %29 = tpu.matmul %28, %26, %cst_24 {dimension_numbers = #tpu.dot_dimension_numbers<[1], [0], [0], [1], [0, 0, 1, 1], [], []>} : vector<16x4xf32>, vector<4x256xf32>, vector<16x256xf32> -> vector<16x256xf32>
    %30 = arith.addf %22, %29 : vector<16x256xf32>
    %c15_i32 = arith.constant 15 : i32
    %31 = tpu.dynamic_rotate %10 by %c15_i32 dim 1 : vector<4x256xf32>, i32 -> vector<4x256xf32>
    %32 = vector.extract_strided_slice %0 {offsets = [2, 0], sizes = [1, 256], strides = [1, 1]} : vector<9x256xf32> to vector<1x256xf32>
    %33 = vector.broadcast %32 : vector<1x256xf32> to vector<4x256xf32>
    %34 = arith.mulf %31, %33 : vector<4x256xf32>
    %35 = vector.extract_strided_slice %6 {offsets = [2, 0, 0], sizes = [1, 16, 4], strides = [1, 1, 1]} : vector<9x16x4xf32> to vector<1x16x4xf32>
    %36 = vector.shape_cast %35 : vector<1x16x4xf32> to vector<16x4xf32>
    %cst_25 = arith.constant dense<0.000000e+00> : vector<16x256xf32>
    %37 = tpu.matmul %36, %34, %cst_25 {dimension_numbers = #tpu.dot_dimension_numbers<[1], [0], [0], [1], [0, 0, 1, 1], [], []>} : vector<16x4xf32>, vector<4x256xf32>, vector<16x256xf32> -> vector<16x256xf32>
    %38 = arith.addf %30, %37 : vector<16x256xf32>
    %c1_i32 = arith.constant 1 : i32
    %39 = tpu.dynamic_rotate %10 by %c1_i32 dim 1 : vector<4x256xf32>, i32 -> vector<4x256xf32>
    %40 = vector.extract_strided_slice %0 {offsets = [3, 0], sizes = [1, 256], strides = [1, 1]} : vector<9x256xf32> to vector<1x256xf32>
    %41 = vector.broadcast %40 : vector<1x256xf32> to vector<4x256xf32>
    %42 = arith.mulf %39, %41 : vector<4x256xf32>
    %43 = vector.extract_strided_slice %6 {offsets = [3, 0, 0], sizes = [1, 16, 4], strides = [1, 1, 1]} : vector<9x16x4xf32> to vector<1x16x4xf32>
    %44 = vector.shape_cast %43 : vector<1x16x4xf32> to vector<16x4xf32>
    %cst_26 = arith.constant dense<0.000000e+00> : vector<16x256xf32>
    %45 = tpu.matmul %44, %42, %cst_26 {dimension_numbers = #tpu.dot_dimension_numbers<[1], [0], [0], [1], [0, 0, 1, 1], [], []>} : vector<16x4xf32>, vector<4x256xf32>, vector<16x256xf32> -> vector<16x256xf32>
    %46 = arith.addf %38, %45 : vector<16x256xf32>
    %c255_i32 = arith.constant 255 : i32
    %47 = tpu.dynamic_rotate %10 by %c255_i32 dim 1 : vector<4x256xf32>, i32 -> vector<4x256xf32>
    %48 = vector.extract_strided_slice %0 {offsets = [5, 0], sizes = [1, 256], strides = [1, 1]} : vector<9x256xf32> to vector<1x256xf32>
    %49 = vector.broadcast %48 : vector<1x256xf32> to vector<4x256xf32>
    %50 = arith.mulf %47, %49 : vector<4x256xf32>
    %51 = vector.extract_strided_slice %6 {offsets = [5, 0, 0], sizes = [1, 16, 4], strides = [1, 1, 1]} : vector<9x16x4xf32> to vector<1x16x4xf32>
    %52 = vector.shape_cast %51 : vector<1x16x4xf32> to vector<16x4xf32>
    %cst_27 = arith.constant dense<0.000000e+00> : vector<16x256xf32>
    %53 = tpu.matmul %52, %50, %cst_27 {dimension_numbers = #tpu.dot_dimension_numbers<[1], [0], [0], [1], [0, 0, 1, 1], [], []>} : vector<16x4xf32>, vector<4x256xf32>, vector<16x256xf32> -> vector<16x256xf32>
    %54 = arith.addf %46, %53 : vector<16x256xf32>
    %c241_i32 = arith.constant 241 : i32
    %55 = tpu.dynamic_rotate %10 by %c241_i32 dim 1 : vector<4x256xf32>, i32 -> vector<4x256xf32>
    %56 = vector.extract_strided_slice %0 {offsets = [6, 0], sizes = [1, 256], strides = [1, 1]} : vector<9x256xf32> to vector<1x256xf32>
    %57 = vector.broadcast %56 : vector<1x256xf32> to vector<4x256xf32>
    %58 = arith.mulf %55, %57 : vector<4x256xf32>
    %59 = vector.extract_strided_slice %6 {offsets = [6, 0, 0], sizes = [1, 16, 4], strides = [1, 1, 1]} : vector<9x16x4xf32> to vector<1x16x4xf32>
    %60 = vector.shape_cast %59 : vector<1x16x4xf32> to vector<16x4xf32>
    %cst_28 = arith.constant dense<0.000000e+00> : vector<16x256xf32>
    %61 = tpu.matmul %60, %58, %cst_28 {dimension_numbers = #tpu.dot_dimension_numbers<[1], [0], [0], [1], [0, 0, 1, 1], [], []>} : vector<16x4xf32>, vector<4x256xf32>, vector<16x256xf32> -> vector<16x256xf32>
    %62 = arith.addf %54, %61 : vector<16x256xf32>
    %c240_i32 = arith.constant 240 : i32
    %63 = tpu.dynamic_rotate %10 by %c240_i32 dim 1 : vector<4x256xf32>, i32 -> vector<4x256xf32>
    %64 = vector.extract_strided_slice %0 {offsets = [7, 0], sizes = [1, 256], strides = [1, 1]} : vector<9x256xf32> to vector<1x256xf32>
    %65 = vector.broadcast %64 : vector<1x256xf32> to vector<4x256xf32>
    %66 = arith.mulf %63, %65 : vector<4x256xf32>
    %67 = vector.extract_strided_slice %6 {offsets = [7, 0, 0], sizes = [1, 16, 4], strides = [1, 1, 1]} : vector<9x16x4xf32> to vector<1x16x4xf32>
    %68 = vector.shape_cast %67 : vector<1x16x4xf32> to vector<16x4xf32>
    %cst_29 = arith.constant dense<0.000000e+00> : vector<16x256xf32>
    %69 = tpu.matmul %68, %66, %cst_29 {dimension_numbers = #tpu.dot_dimension_numbers<[1], [0], [0], [1], [0, 0, 1, 1], [], []>} : vector<16x4xf32>, vector<4x256xf32>, vector<16x256xf32> -> vector<16x256xf32>
    %70 = arith.addf %62, %69 : vector<16x256xf32>
    %c239_i32 = arith.constant 239 : i32
    %71 = tpu.dynamic_rotate %10 by %c239_i32 dim 1 : vector<4x256xf32>, i32 -> vector<4x256xf32>
    %72 = vector.extract_strided_slice %0 {offsets = [8, 0], sizes = [1, 256], strides = [1, 1]} : vector<9x256xf32> to vector<1x256xf32>
    %73 = vector.broadcast %72 : vector<1x256xf32> to vector<4x256xf32>
    %74 = arith.mulf %71, %73 : vector<4x256xf32>
    %75 = vector.extract_strided_slice %6 {offsets = [8, 0, 0], sizes = [1, 16, 4], strides = [1, 1, 1]} : vector<9x16x4xf32> to vector<1x16x4xf32>
    %76 = vector.shape_cast %75 : vector<1x16x4xf32> to vector<16x4xf32>
    %cst_30 = arith.constant dense<0.000000e+00> : vector<16x256xf32>
    %77 = tpu.matmul %76, %74, %cst_30 {dimension_numbers = #tpu.dot_dimension_numbers<[1], [0], [0], [1], [0, 0, 1, 1], [], []>} : vector<16x4xf32>, vector<4x256xf32>, vector<16x256xf32> -> vector<16x256xf32>
    %78 = arith.addf %70, %77 : vector<16x256xf32>
    %cst_31 = arith.constant dense<0.000000e+00> : vector<16xf32>
    %79 = vector.multi_reduction <add>, %78, %cst_31 [1] : vector<16x256xf32> to vector<16xf32>
    %80 = vector.shape_cast %79 : vector<16xf32> to vector<16x1xf32>
    %cst_32 = arith.constant dense<0.000000e+00> : vector<16x1xf32>
    %81 = tpu.matmul %1, %80, %cst_32 {dimension_numbers = #tpu.dot_dimension_numbers<[1], [0], [0], [1], [0, 0, 1, 1], [], []>} : vector<16x16xf32>, vector<16x1xf32>, vector<16x1xf32> -> vector<16x1xf32>
    %82 = vector.broadcast %81 : vector<16x1xf32> to vector<16x256xf32>
    %83 = arith.subf %78, %82 : vector<16x256xf32>
    %84 = arith.mulf %83, %83 : vector<16x256xf32>
    %cst_33 = arith.constant dense<0.000000e+00> : vector<16xf32>
    %85 = vector.multi_reduction <add>, %84, %cst_33 [1] : vector<16x256xf32> to vector<16xf32>
    %86 = vector.shape_cast %85 : vector<16xf32> to vector<16x1xf32>
    %cst_34 = arith.constant dense<0.000000e+00> : vector<16x1xf32>
    %87 = tpu.matmul %1, %86, %cst_34 {dimension_numbers = #tpu.dot_dimension_numbers<[1], [0], [0], [1], [0, 0, 1, 1], [], []>} : vector<16x16xf32>, vector<16x1xf32>, vector<16x1xf32> -> vector<16x1xf32>
    %cst_35 = arith.constant 9.99999974E-6 : f32
    %88 = vector.broadcast %cst_35 : f32 to vector<16x1xf32>
    %89 = arith.addf %87, %88 : vector<16x1xf32>
    %90 = math.rsqrt %89 : vector<16x1xf32>
    %91 = arith.mulf %90, %2 : vector<16x1xf32>
    %92 = vector.broadcast %91 : vector<16x1xf32> to vector<16x256xf32>
    %93 = arith.mulf %83, %92 : vector<16x256xf32>
    %94 = vector.broadcast %3 : vector<16x1xf32> to vector<16x256xf32>
    %95 = arith.addf %93, %94 : vector<16x256xf32>
    %cst_36 = arith.constant 0.000000e+00 : f32
    %96 = vector.broadcast %cst_36 : f32 to vector<16x256xf32>
    %97 = arith.maximumf %95, %96 : vector<16x256xf32>
    %98 = vector.extract_strided_slice %7 {offsets = [4, 0, 0], sizes = [1, 16, 16], strides = [1, 1, 1]} : vector<9x16x16xf32> to vector<1x16x16xf32>
    %99 = vector.shape_cast %98 : vector<1x16x16xf32> to vector<16x16xf32>
    %cst_37 = arith.constant dense<0.000000e+00> : vector<16x256xf32>
    %100 = tpu.matmul %99, %97, %cst_37 {dimension_numbers = #tpu.dot_dimension_numbers<[1], [0], [0], [1], [0, 0, 1, 1], [], []>} : vector<16x16xf32>, vector<16x256xf32>, vector<16x256xf32> -> vector<16x256xf32>
    %c17_i32_38 = arith.constant 17 : i32
    %101 = tpu.dynamic_rotate %97 by %c17_i32_38 dim 1 : vector<16x256xf32>, i32 -> vector<16x256xf32>
    %102 = vector.extract_strided_slice %0 {offsets = [0, 0], sizes = [1, 256], strides = [1, 1]} : vector<9x256xf32> to vector<1x256xf32>
    %103 = vector.broadcast %102 : vector<1x256xf32> to vector<16x256xf32>
    %104 = arith.mulf %101, %103 : vector<16x256xf32>
    %105 = vector.extract_strided_slice %7 {offsets = [0, 0, 0], sizes = [1, 16, 16], strides = [1, 1, 1]} : vector<9x16x16xf32> to vector<1x16x16xf32>
    %106 = vector.shape_cast %105 : vector<1x16x16xf32> to vector<16x16xf32>
    %cst_39 = arith.constant dense<0.000000e+00> : vector<16x256xf32>
    %107 = tpu.matmul %106, %104, %cst_39 {dimension_numbers = #tpu.dot_dimension_numbers<[1], [0], [0], [1], [0, 0, 1, 1], [], []>} : vector<16x16xf32>, vector<16x256xf32>, vector<16x256xf32> -> vector<16x256xf32>
    %108 = arith.addf %100, %107 : vector<16x256xf32>
    %c16_i32_40 = arith.constant 16 : i32
    %109 = tpu.dynamic_rotate %97 by %c16_i32_40 dim 1 : vector<16x256xf32>, i32 -> vector<16x256xf32>
    %110 = vector.extract_strided_slice %0 {offsets = [1, 0], sizes = [1, 256], strides = [1, 1]} : vector<9x256xf32> to vector<1x256xf32>
    %111 = vector.broadcast %110 : vector<1x256xf32> to vector<16x256xf32>
    %112 = arith.mulf %109, %111 : vector<16x256xf32>
    %113 = vector.extract_strided_slice %7 {offsets = [1, 0, 0], sizes = [1, 16, 16], strides = [1, 1, 1]} : vector<9x16x16xf32> to vector<1x16x16xf32>
    %114 = vector.shape_cast %113 : vector<1x16x16xf32> to vector<16x16xf32>
    %cst_41 = arith.constant dense<0.000000e+00> : vector<16x256xf32>
    %115 = tpu.matmul %114, %112, %cst_41 {dimension_numbers = #tpu.dot_dimension_numbers<[1], [0], [0], [1], [0, 0, 1, 1], [], []>} : vector<16x16xf32>, vector<16x256xf32>, vector<16x256xf32> -> vector<16x256xf32>
    %116 = arith.addf %108, %115 : vector<16x256xf32>
    %c15_i32_42 = arith.constant 15 : i32
    %117 = tpu.dynamic_rotate %97 by %c15_i32_42 dim 1 : vector<16x256xf32>, i32 -> vector<16x256xf32>
    %118 = vector.extract_strided_slice %0 {offsets = [2, 0], sizes = [1, 256], strides = [1, 1]} : vector<9x256xf32> to vector<1x256xf32>
    %119 = vector.broadcast %118 : vector<1x256xf32> to vector<16x256xf32>
    %120 = arith.mulf %117, %119 : vector<16x256xf32>
    %121 = vector.extract_strided_slice %7 {offsets = [2, 0, 0], sizes = [1, 16, 16], strides = [1, 1, 1]} : vector<9x16x16xf32> to vector<1x16x16xf32>
    %122 = vector.shape_cast %121 : vector<1x16x16xf32> to vector<16x16xf32>
    %cst_43 = arith.constant dense<0.000000e+00> : vector<16x256xf32>
    %123 = tpu.matmul %122, %120, %cst_43 {dimension_numbers = #tpu.dot_dimension_numbers<[1], [0], [0], [1], [0, 0, 1, 1], [], []>} : vector<16x16xf32>, vector<16x256xf32>, vector<16x256xf32> -> vector<16x256xf32>
    %124 = arith.addf %116, %123 : vector<16x256xf32>
    %c1_i32_44 = arith.constant 1 : i32
    %125 = tpu.dynamic_rotate %97 by %c1_i32_44 dim 1 : vector<16x256xf32>, i32 -> vector<16x256xf32>
    %126 = vector.extract_strided_slice %0 {offsets = [3, 0], sizes = [1, 256], strides = [1, 1]} : vector<9x256xf32> to vector<1x256xf32>
    %127 = vector.broadcast %126 : vector<1x256xf32> to vector<16x256xf32>
    %128 = arith.mulf %125, %127 : vector<16x256xf32>
    %129 = vector.extract_strided_slice %7 {offsets = [3, 0, 0], sizes = [1, 16, 16], strides = [1, 1, 1]} : vector<9x16x16xf32> to vector<1x16x16xf32>
    %130 = vector.shape_cast %129 : vector<1x16x16xf32> to vector<16x16xf32>
    %cst_45 = arith.constant dense<0.000000e+00> : vector<16x256xf32>
    %131 = tpu.matmul %130, %128, %cst_45 {dimension_numbers = #tpu.dot_dimension_numbers<[1], [0], [0], [1], [0, 0, 1, 1], [], []>} : vector<16x16xf32>, vector<16x256xf32>, vector<16x256xf32> -> vector<16x256xf32>
    %132 = arith.addf %124, %131 : vector<16x256xf32>
    %c255_i32_46 = arith.constant 255 : i32
    %133 = tpu.dynamic_rotate %97 by %c255_i32_46 dim 1 : vector<16x256xf32>, i32 -> vector<16x256xf32>
    %134 = vector.extract_strided_slice %0 {offsets = [5, 0], sizes = [1, 256], strides = [1, 1]} : vector<9x256xf32> to vector<1x256xf32>
    %135 = vector.broadcast %134 : vector<1x256xf32> to vector<16x256xf32>
    %136 = arith.mulf %133, %135 : vector<16x256xf32>
    %137 = vector.extract_strided_slice %7 {offsets = [5, 0, 0], sizes = [1, 16, 16], strides = [1, 1, 1]} : vector<9x16x16xf32> to vector<1x16x16xf32>
    %138 = vector.shape_cast %137 : vector<1x16x16xf32> to vector<16x16xf32>
    %cst_47 = arith.constant dense<0.000000e+00> : vector<16x256xf32>
    %139 = tpu.matmul %138, %136, %cst_47 {dimension_numbers = #tpu.dot_dimension_numbers<[1], [0], [0], [1], [0, 0, 1, 1], [], []>} : vector<16x16xf32>, vector<16x256xf32>, vector<16x256xf32> -> vector<16x256xf32>
    %140 = arith.addf %132, %139 : vector<16x256xf32>
    %c241_i32_48 = arith.constant 241 : i32
    %141 = tpu.dynamic_rotate %97 by %c241_i32_48 dim 1 : vector<16x256xf32>, i32 -> vector<16x256xf32>
    %142 = vector.extract_strided_slice %0 {offsets = [6, 0], sizes = [1, 256], strides = [1, 1]} : vector<9x256xf32> to vector<1x256xf32>
    %143 = vector.broadcast %142 : vector<1x256xf32> to vector<16x256xf32>
    %144 = arith.mulf %141, %143 : vector<16x256xf32>
    %145 = vector.extract_strided_slice %7 {offsets = [6, 0, 0], sizes = [1, 16, 16], strides = [1, 1, 1]} : vector<9x16x16xf32> to vector<1x16x16xf32>
    %146 = vector.shape_cast %145 : vector<1x16x16xf32> to vector<16x16xf32>
    %cst_49 = arith.constant dense<0.000000e+00> : vector<16x256xf32>
    %147 = tpu.matmul %146, %144, %cst_49 {dimension_numbers = #tpu.dot_dimension_numbers<[1], [0], [0], [1], [0, 0, 1, 1], [], []>} : vector<16x16xf32>, vector<16x256xf32>, vector<16x256xf32> -> vector<16x256xf32>
    %148 = arith.addf %140, %147 : vector<16x256xf32>
    %c240_i32_50 = arith.constant 240 : i32
    %149 = tpu.dynamic_rotate %97 by %c240_i32_50 dim 1 : vector<16x256xf32>, i32 -> vector<16x256xf32>
    %150 = vector.extract_strided_slice %0 {offsets = [7, 0], sizes = [1, 256], strides = [1, 1]} : vector<9x256xf32> to vector<1x256xf32>
    %151 = vector.broadcast %150 : vector<1x256xf32> to vector<16x256xf32>
    %152 = arith.mulf %149, %151 : vector<16x256xf32>
    %153 = vector.extract_strided_slice %7 {offsets = [7, 0, 0], sizes = [1, 16, 16], strides = [1, 1, 1]} : vector<9x16x16xf32> to vector<1x16x16xf32>
    %154 = vector.shape_cast %153 : vector<1x16x16xf32> to vector<16x16xf32>
    %cst_51 = arith.constant dense<0.000000e+00> : vector<16x256xf32>
    %155 = tpu.matmul %154, %152, %cst_51 {dimension_numbers = #tpu.dot_dimension_numbers<[1], [0], [0], [1], [0, 0, 1, 1], [], []>} : vector<16x16xf32>, vector<16x256xf32>, vector<16x256xf32> -> vector<16x256xf32>
    %156 = arith.addf %148, %155 : vector<16x256xf32>
    %c239_i32_52 = arith.constant 239 : i32
    %157 = tpu.dynamic_rotate %97 by %c239_i32_52 dim 1 : vector<16x256xf32>, i32 -> vector<16x256xf32>
    %158 = vector.extract_strided_slice %0 {offsets = [8, 0], sizes = [1, 256], strides = [1, 1]} : vector<9x256xf32> to vector<1x256xf32>
    %159 = vector.broadcast %158 : vector<1x256xf32> to vector<16x256xf32>
    %160 = arith.mulf %157, %159 : vector<16x256xf32>
    %161 = vector.extract_strided_slice %7 {offsets = [8, 0, 0], sizes = [1, 16, 16], strides = [1, 1, 1]} : vector<9x16x16xf32> to vector<1x16x16xf32>
    %162 = vector.shape_cast %161 : vector<1x16x16xf32> to vector<16x16xf32>
    %cst_53 = arith.constant dense<0.000000e+00> : vector<16x256xf32>
    %163 = tpu.matmul %162, %160, %cst_53 {dimension_numbers = #tpu.dot_dimension_numbers<[1], [0], [0], [1], [0, 0, 1, 1], [], []>} : vector<16x16xf32>, vector<16x256xf32>, vector<16x256xf32> -> vector<16x256xf32>
    %164 = arith.addf %156, %163 : vector<16x256xf32>
    %cst_54 = arith.constant dense<0.000000e+00> : vector<16xf32>
    %165 = vector.multi_reduction <add>, %164, %cst_54 [1] : vector<16x256xf32> to vector<16xf32>
    %166 = vector.shape_cast %165 : vector<16xf32> to vector<16x1xf32>
    %cst_55 = arith.constant dense<0.000000e+00> : vector<16x1xf32>
    %167 = tpu.matmul %1, %166, %cst_55 {dimension_numbers = #tpu.dot_dimension_numbers<[1], [0], [0], [1], [0, 0, 1, 1], [], []>} : vector<16x16xf32>, vector<16x1xf32>, vector<16x1xf32> -> vector<16x1xf32>
    %168 = vector.broadcast %167 : vector<16x1xf32> to vector<16x256xf32>
    %169 = arith.subf %164, %168 : vector<16x256xf32>
    %170 = arith.mulf %169, %169 : vector<16x256xf32>
    %cst_56 = arith.constant dense<0.000000e+00> : vector<16xf32>
    %171 = vector.multi_reduction <add>, %170, %cst_56 [1] : vector<16x256xf32> to vector<16xf32>
    %172 = vector.shape_cast %171 : vector<16xf32> to vector<16x1xf32>
    %cst_57 = arith.constant dense<0.000000e+00> : vector<16x1xf32>
    %173 = tpu.matmul %1, %172, %cst_57 {dimension_numbers = #tpu.dot_dimension_numbers<[1], [0], [0], [1], [0, 0, 1, 1], [], []>} : vector<16x16xf32>, vector<16x1xf32>, vector<16x1xf32> -> vector<16x1xf32>
    %cst_58 = arith.constant 9.99999974E-6 : f32
    %174 = vector.broadcast %cst_58 : f32 to vector<16x1xf32>
    %175 = arith.addf %173, %174 : vector<16x1xf32>
    %176 = math.rsqrt %175 : vector<16x1xf32>
    %177 = arith.mulf %176, %4 : vector<16x1xf32>
    %178 = vector.broadcast %177 : vector<16x1xf32> to vector<16x256xf32>
    %179 = arith.mulf %169, %178 : vector<16x256xf32>
    %180 = vector.broadcast %5 : vector<16x1xf32> to vector<16x256xf32>
    %181 = arith.addf %179, %180 : vector<16x256xf32>
    %182 = arith.addf %181, %11 : vector<16x256xf32>
    %cst_59 = arith.constant 0.000000e+00 : f32
    %183 = vector.broadcast %cst_59 : f32 to vector<16x256xf32>
    %184 = arith.maximumf %182, %183 : vector<16x256xf32>
    %c0_60 = arith.constant 0 : index
    %c0_61 = arith.constant 0 : index
    %c0_62 = arith.constant 0 : index
    %185 = vector.load %arg11[%c0_60, %c0_61, %c0_62] : memref<2x16x256xf32, #tpu.memory_space<vmem>>, vector<1x16x256xf32>
    %186 = vector.shape_cast %185 : vector<1x16x256xf32> to vector<16x256xf32>
    %187 = vector.shape_cast %184 : vector<16x256xf32> to vector<1x16x256xf32>
    tpu.vector_store %arg11[%c0_60, %c0_61, %c0_62], %187 {strides = array<i32>} : memref<2x16x256xf32, #tpu.memory_space<vmem>>, vector<1x16x256xf32>,
    %c1 = arith.constant 1 : index
    %c0_63 = arith.constant 0 : index
    %c0_64 = arith.constant 0 : index
    %188 = vector.load %arg1[%c1, %c0_63, %c0_64] : memref<2x4x256xf32, #tpu.memory_space<vmem>>, vector<1x4x256xf32>
    %189 = vector.shape_cast %188 : vector<1x4x256xf32> to vector<4x256xf32>
    %cst_65 = arith.constant dense<0.000000e+00> : vector<16x256xf32>
    %190 = tpu.matmul %8, %189, %cst_65 {dimension_numbers = #tpu.dot_dimension_numbers<[1], [0], [0], [1], [0, 0, 1, 1], [], []>} : vector<16x4xf32>, vector<4x256xf32>, vector<16x256xf32> -> vector<16x256xf32>
    %191 = vector.extract_strided_slice %6 {offsets = [4, 0, 0], sizes = [1, 16, 4], strides = [1, 1, 1]} : vector<9x16x4xf32> to vector<1x16x4xf32>
    %192 = vector.shape_cast %191 : vector<1x16x4xf32> to vector<16x4xf32>
    %cst_66 = arith.constant dense<0.000000e+00> : vector<16x256xf32>
    %193 = tpu.matmul %192, %189, %cst_66 {dimension_numbers = #tpu.dot_dimension_numbers<[1], [0], [0], [1], [0, 0, 1, 1], [], []>} : vector<16x4xf32>, vector<4x256xf32>, vector<16x256xf32> -> vector<16x256xf32>
    %c17_i32_67 = arith.constant 17 : i32
    %194 = tpu.dynamic_rotate %189 by %c17_i32_67 dim 1 : vector<4x256xf32>, i32 -> vector<4x256xf32>
    %195 = vector.extract_strided_slice %0 {offsets = [0, 0], sizes = [1, 256], strides = [1, 1]} : vector<9x256xf32> to vector<1x256xf32>
    %196 = vector.broadcast %195 : vector<1x256xf32> to vector<4x256xf32>
    %197 = arith.mulf %194, %196 : vector<4x256xf32>
    %198 = vector.extract_strided_slice %6 {offsets = [0, 0, 0], sizes = [1, 16, 4], strides = [1, 1, 1]} : vector<9x16x4xf32> to vector<1x16x4xf32>
    %199 = vector.shape_cast %198 : vector<1x16x4xf32> to vector<16x4xf32>
    %cst_68 = arith.constant dense<0.000000e+00> : vector<16x256xf32>
    %200 = tpu.matmul %199, %197, %cst_68 {dimension_numbers = #tpu.dot_dimension_numbers<[1], [0], [0], [1], [0, 0, 1, 1], [], []>} : vector<16x4xf32>, vector<4x256xf32>, vector<16x256xf32> -> vector<16x256xf32>
    %201 = arith.addf %193, %200 : vector<16x256xf32>
    %c16_i32_69 = arith.constant 16 : i32
    %202 = tpu.dynamic_rotate %189 by %c16_i32_69 dim 1 : vector<4x256xf32>, i32 -> vector<4x256xf32>
    %203 = vector.extract_strided_slice %0 {offsets = [1, 0], sizes = [1, 256], strides = [1, 1]} : vector<9x256xf32> to vector<1x256xf32>
    %204 = vector.broadcast %203 : vector<1x256xf32> to vector<4x256xf32>
    %205 = arith.mulf %202, %204 : vector<4x256xf32>
    %206 = vector.extract_strided_slice %6 {offsets = [1, 0, 0], sizes = [1, 16, 4], strides = [1, 1, 1]} : vector<9x16x4xf32> to vector<1x16x4xf32>
    %207 = vector.shape_cast %206 : vector<1x16x4xf32> to vector<16x4xf32>
    %cst_70 = arith.constant dense<0.000000e+00> : vector<16x256xf32>
    %208 = tpu.matmul %207, %205, %cst_70 {dimension_numbers = #tpu.dot_dimension_numbers<[1], [0], [0], [1], [0, 0, 1, 1], [], []>} : vector<16x4xf32>, vector<4x256xf32>, vector<16x256xf32> -> vector<16x256xf32>
    %209 = arith.addf %201, %208 : vector<16x256xf32>
    %c15_i32_71 = arith.constant 15 : i32
    %210 = tpu.dynamic_rotate %189 by %c15_i32_71 dim 1 : vector<4x256xf32>, i32 -> vector<4x256xf32>
    %211 = vector.extract_strided_slice %0 {offsets = [2, 0], sizes = [1, 256], strides = [1, 1]} : vector<9x256xf32> to vector<1x256xf32>
    %212 = vector.broadcast %211 : vector<1x256xf32> to vector<4x256xf32>
    %213 = arith.mulf %210, %212 : vector<4x256xf32>
    %214 = vector.extract_strided_slice %6 {offsets = [2, 0, 0], sizes = [1, 16, 4], strides = [1, 1, 1]} : vector<9x16x4xf32> to vector<1x16x4xf32>
    %215 = vector.shape_cast %214 : vector<1x16x4xf32> to vector<16x4xf32>
    %cst_72 = arith.constant dense<0.000000e+00> : vector<16x256xf32>
    %216 = tpu.matmul %215, %213, %cst_72 {dimension_numbers = #tpu.dot_dimension_numbers<[1], [0], [0], [1], [0, 0, 1, 1], [], []>} : vector<16x4xf32>, vector<4x256xf32>, vector<16x256xf32> -> vector<16x256xf32>
    %217 = arith.addf %209, %216 : vector<16x256xf32>
    %c1_i32_73 = arith.constant 1 : i32
    %218 = tpu.dynamic_rotate %189 by %c1_i32_73 dim 1 : vector<4x256xf32>, i32 -> vector<4x256xf32>
    %219 = vector.extract_strided_slice %0 {offsets = [3, 0], sizes = [1, 256], strides = [1, 1]} : vector<9x256xf32> to vector<1x256xf32>
    %220 = vector.broadcast %219 : vector<1x256xf32> to vector<4x256xf32>
    %221 = arith.mulf %218, %220 : vector<4x256xf32>
    %222 = vector.extract_strided_slice %6 {offsets = [3, 0, 0], sizes = [1, 16, 4], strides = [1, 1, 1]} : vector<9x16x4xf32> to vector<1x16x4xf32>
    %223 = vector.shape_cast %222 : vector<1x16x4xf32> to vector<16x4xf32>
    %cst_74 = arith.constant dense<0.000000e+00> : vector<16x256xf32>
    %224 = tpu.matmul %223, %221, %cst_74 {dimension_numbers = #tpu.dot_dimension_numbers<[1], [0], [0], [1], [0, 0, 1, 1], [], []>} : vector<16x4xf32>, vector<4x256xf32>, vector<16x256xf32> -> vector<16x256xf32>
    %225 = arith.addf %217, %224 : vector<16x256xf32>
    %c255_i32_75 = arith.constant 255 : i32
    %226 = tpu.dynamic_rotate %189 by %c255_i32_75 dim 1 : vector<4x256xf32>, i32 -> vector<4x256xf32>
    %227 = vector.extract_strided_slice %0 {offsets = [5, 0], sizes = [1, 256], strides = [1, 1]} : vector<9x256xf32> to vector<1x256xf32>
    %228 = vector.broadcast %227 : vector<1x256xf32> to vector<4x256xf32>
    %229 = arith.mulf %226, %228 : vector<4x256xf32>
    %230 = vector.extract_strided_slice %6 {offsets = [5, 0, 0], sizes = [1, 16, 4], strides = [1, 1, 1]} : vector<9x16x4xf32> to vector<1x16x4xf32>
    %231 = vector.shape_cast %230 : vector<1x16x4xf32> to vector<16x4xf32>
    %cst_76 = arith.constant dense<0.000000e+00> : vector<16x256xf32>
    %232 = tpu.matmul %231, %229, %cst_76 {dimension_numbers = #tpu.dot_dimension_numbers<[1], [0], [0], [1], [0, 0, 1, 1], [], []>} : vector<16x4xf32>, vector<4x256xf32>, vector<16x256xf32> -> vector<16x256xf32>
    %233 = arith.addf %225, %232 : vector<16x256xf32>
    %c241_i32_77 = arith.constant 241 : i32
    %234 = tpu.dynamic_rotate %189 by %c241_i32_77 dim 1 : vector<4x256xf32>, i32 -> vector<4x256xf32>
    %235 = vector.extract_strided_slice %0 {offsets = [6, 0], sizes = [1, 256], strides = [1, 1]} : vector<9x256xf32> to vector<1x256xf32>
    %236 = vector.broadcast %235 : vector<1x256xf32> to vector<4x256xf32>
    %237 = arith.mulf %234, %236 : vector<4x256xf32>
    %238 = vector.extract_strided_slice %6 {offsets = [6, 0, 0], sizes = [1, 16, 4], strides = [1, 1, 1]} : vector<9x16x4xf32> to vector<1x16x4xf32>
    %239 = vector.shape_cast %238 : vector<1x16x4xf32> to vector<16x4xf32>
    %cst_78 = arith.constant dense<0.000000e+00> : vector<16x256xf32>
    %240 = tpu.matmul %239, %237, %cst_78 {dimension_numbers = #tpu.dot_dimension_numbers<[1], [0], [0], [1], [0, 0, 1, 1], [], []>} : vector<16x4xf32>, vector<4x256xf32>, vector<16x256xf32> -> vector<16x256xf32>
    %241 = arith.addf %233, %240 : vector<16x256xf32>
    %c240_i32_79 = arith.constant 240 : i32
    %242 = tpu.dynamic_rotate %189 by %c240_i32_79 dim 1 : vector<4x256xf32>, i32 -> vector<4x256xf32>
    %243 = vector.extract_strided_slice %0 {offsets = [7, 0], sizes = [1, 256], strides = [1, 1]} : vector<9x256xf32> to vector<1x256xf32>
    %244 = vector.broadcast %243 : vector<1x256xf32> to vector<4x256xf32>
    %245 = arith.mulf %242, %244 : vector<4x256xf32>
    %246 = vector.extract_strided_slice %6 {offsets = [7, 0, 0], sizes = [1, 16, 4], strides = [1, 1, 1]} : vector<9x16x4xf32> to vector<1x16x4xf32>
    %247 = vector.shape_cast %246 : vector<1x16x4xf32> to vector<16x4xf32>
    %cst_80 = arith.constant dense<0.000000e+00> : vector<16x256xf32>
    %248 = tpu.matmul %247, %245, %cst_80 {dimension_numbers = #tpu.dot_dimension_numbers<[1], [0], [0], [1], [0, 0, 1, 1], [], []>} : vector<16x4xf32>, vector<4x256xf32>, vector<16x256xf32> -> vector<16x256xf32>
    %249 = arith.addf %241, %248 : vector<16x256xf32>
    %c239_i32_81 = arith.constant 239 : i32
    %250 = tpu.dynamic_rotate %189 by %c239_i32_81 dim 1 : vector<4x256xf32>, i32 -> vector<4x256xf32>
    %251 = vector.extract_strided_slice %0 {offsets = [8, 0], sizes = [1, 256], strides = [1, 1]} : vector<9x256xf32> to vector<1x256xf32>
    %252 = vector.broadcast %251 : vector<1x256xf32> to vector<4x256xf32>
    %253 = arith.mulf %250, %252 : vector<4x256xf32>
    %254 = vector.extract_strided_slice %6 {offsets = [8, 0, 0], sizes = [1, 16, 4], strides = [1, 1, 1]} : vector<9x16x4xf32> to vector<1x16x4xf32>
    %255 = vector.shape_cast %254 : vector<1x16x4xf32> to vector<16x4xf32>
    %cst_82 = arith.constant dense<0.000000e+00> : vector<16x256xf32>
    %256 = tpu.matmul %255, %253, %cst_82 {dimension_numbers = #tpu.dot_dimension_numbers<[1], [0], [0], [1], [0, 0, 1, 1], [], []>} : vector<16x4xf32>, vector<4x256xf32>, vector<16x256xf32> -> vector<16x256xf32>
    %257 = arith.addf %249, %256 : vector<16x256xf32>
    %cst_83 = arith.constant dense<0.000000e+00> : vector<16xf32>
    %258 = vector.multi_reduction <add>, %257, %cst_83 [1] : vector<16x256xf32> to vector<16xf32>
    %259 = vector.shape_cast %258 : vector<16xf32> to vector<16x1xf32>
    %cst_84 = arith.constant dense<0.000000e+00> : vector<16x1xf32>
    %260 = tpu.matmul %1, %259, %cst_84 {dimension_numbers = #tpu.dot_dimension_numbers<[1], [0], [0], [1], [0, 0, 1, 1], [], []>} : vector<16x16xf32>, vector<16x1xf32>, vector<16x1xf32> -> vector<16x1xf32>
    %261 = vector.broadcast %260 : vector<16x1xf32> to vector<16x256xf32>
    %262 = arith.subf %257, %261 : vector<16x256xf32>
    %263 = arith.mulf %262, %262 : vector<16x256xf32>
    %cst_85 = arith.constant dense<0.000000e+00> : vector<16xf32>
    %264 = vector.multi_reduction <add>, %263, %cst_85 [1] : vector<16x256xf32> to vector<16xf32>
    %265 = vector.shape_cast %264 : vector<16xf32> to vector<16x1xf32>
    %cst_86 = arith.constant dense<0.000000e+00> : vector<16x1xf32>
    %266 = tpu.matmul %1, %265, %cst_86 {dimension_numbers = #tpu.dot_dimension_numbers<[1], [0], [0], [1], [0, 0, 1, 1], [], []>} : vector<16x16xf32>, vector<16x1xf32>, vector<16x1xf32> -> vector<16x1xf32>
    %cst_87 = arith.constant 9.99999974E-6 : f32
    %267 = vector.broadcast %cst_87 : f32 to vector<16x1xf32>
    %268 = arith.addf %266, %267 : vector<16x1xf32>
    %269 = math.rsqrt %268 : vector<16x1xf32>
    %270 = arith.mulf %269, %2 : vector<16x1xf32>
    %271 = vector.broadcast %270 : vector<16x1xf32> to vector<16x256xf32>
    %272 = arith.mulf %262, %271 : vector<16x256xf32>
    %273 = vector.broadcast %3 : vector<16x1xf32> to vector<16x256xf32>
    %274 = arith.addf %272, %273 : vector<16x256xf32>
    %cst_88 = arith.constant 0.000000e+00 : f32
    %275 = vector.broadcast %cst_88 : f32 to vector<16x256xf32>
    %276 = arith.maximumf %274, %275 : vector<16x256xf32>
    %277 = vector.extract_strided_slice %7 {offsets = [4, 0, 0], sizes = [1, 16, 16], strides = [1, 1, 1]} : vector<9x16x16xf32> to vector<1x16x16xf32>
    %278 = vector.shape_cast %277 : vector<1x16x16xf32> to vector<16x16xf32>
    %cst_89 = arith.constant dense<0.000000e+00> : vector<16x256xf32>
    %279 = tpu.matmul %278, %276, %cst_89 {dimension_numbers = #tpu.dot_dimension_numbers<[1], [0], [0], [1], [0, 0, 1, 1], [], []>} : vector<16x16xf32>, vector<16x256xf32>, vector<16x256xf32> -> vector<16x256xf32>
    %c17_i32_90 = arith.constant 17 : i32
    %280 = tpu.dynamic_rotate %276 by %c17_i32_90 dim 1 : vector<16x256xf32>, i32 -> vector<16x256xf32>
    %281 = vector.extract_strided_slice %0 {offsets = [0, 0], sizes = [1, 256], strides = [1, 1]} : vector<9x256xf32> to vector<1x256xf32>
    %282 = vector.broadcast %281 : vector<1x256xf32> to vector<16x256xf32>
    %283 = arith.mulf %280, %282 : vector<16x256xf32>
    %284 = vector.extract_strided_slice %7 {offsets = [0, 0, 0], sizes = [1, 16, 16], strides = [1, 1, 1]} : vector<9x16x16xf32> to vector<1x16x16xf32>
    %285 = vector.shape_cast %284 : vector<1x16x16xf32> to vector<16x16xf32>
    %cst_91 = arith.constant dense<0.000000e+00> : vector<16x256xf32>
    %286 = tpu.matmul %285, %283, %cst_91 {dimension_numbers = #tpu.dot_dimension_numbers<[1], [0], [0], [1], [0, 0, 1, 1], [], []>} : vector<16x16xf32>, vector<16x256xf32>, vector<16x256xf32> -> vector<16x256xf32>
    %287 = arith.addf %279, %286 : vector<16x256xf32>
    %c16_i32_92 = arith.constant 16 : i32
    %288 = tpu.dynamic_rotate %276 by %c16_i32_92 dim 1 : vector<16x256xf32>, i32 -> vector<16x256xf32>
    %289 = vector.extract_strided_slice %0 {offsets = [1, 0], sizes = [1, 256], strides = [1, 1]} : vector<9x256xf32> to vector<1x256xf32>
    %290 = vector.broadcast %289 : vector<1x256xf32> to vector<16x256xf32>
    %291 = arith.mulf %288, %290 : vector<16x256xf32>
    %292 = vector.extract_strided_slice %7 {offsets = [1, 0, 0], sizes = [1, 16, 16], strides = [1, 1, 1]} : vector<9x16x16xf32> to vector<1x16x16xf32>
    %293 = vector.shape_cast %292 : vector<1x16x16xf32> to vector<16x16xf32>
    %cst_93 = arith.constant dense<0.000000e+00> : vector<16x256xf32>
    %294 = tpu.matmul %293, %291, %cst_93 {dimension_numbers = #tpu.dot_dimension_numbers<[1], [0], [0], [1], [0, 0, 1, 1], [], []>} : vector<16x16xf32>, vector<16x256xf32>, vector<16x256xf32> -> vector<16x256xf32>
    %295 = arith.addf %287, %294 : vector<16x256xf32>
    %c15_i32_94 = arith.constant 15 : i32
    %296 = tpu.dynamic_rotate %276 by %c15_i32_94 dim 1 : vector<16x256xf32>, i32 -> vector<16x256xf32>
    %297 = vector.extract_strided_slice %0 {offsets = [2, 0], sizes = [1, 256], strides = [1, 1]} : vector<9x256xf32> to vector<1x256xf32>
    %298 = vector.broadcast %297 : vector<1x256xf32> to vector<16x256xf32>
    %299 = arith.mulf %296, %298 : vector<16x256xf32>
    %300 = vector.extract_strided_slice %7 {offsets = [2, 0, 0], sizes = [1, 16, 16], strides = [1, 1, 1]} : vector<9x16x16xf32> to vector<1x16x16xf32>
    %301 = vector.shape_cast %300 : vector<1x16x16xf32> to vector<16x16xf32>
    %cst_95 = arith.constant dense<0.000000e+00> : vector<16x256xf32>
    %302 = tpu.matmul %301, %299, %cst_95 {dimension_numbers = #tpu.dot_dimension_numbers<[1], [0], [0], [1], [0, 0, 1, 1], [], []>} : vector<16x16xf32>, vector<16x256xf32>, vector<16x256xf32> -> vector<16x256xf32>
    %303 = arith.addf %295, %302 : vector<16x256xf32>
    %c1_i32_96 = arith.constant 1 : i32
    %304 = tpu.dynamic_rotate %276 by %c1_i32_96 dim 1 : vector<16x256xf32>, i32 -> vector<16x256xf32>
    %305 = vector.extract_strided_slice %0 {offsets = [3, 0], sizes = [1, 256], strides = [1, 1]} : vector<9x256xf32> to vector<1x256xf32>
    %306 = vector.broadcast %305 : vector<1x256xf32> to vector<16x256xf32>
    %307 = arith.mulf %304, %306 : vector<16x256xf32>
    %308 = vector.extract_strided_slice %7 {offsets = [3, 0, 0], sizes = [1, 16, 16], strides = [1, 1, 1]} : vector<9x16x16xf32> to vector<1x16x16xf32>
    %309 = vector.shape_cast %308 : vector<1x16x16xf32> to vector<16x16xf32>
    %cst_97 = arith.constant dense<0.000000e+00> : vector<16x256xf32>
    %310 = tpu.matmul %309, %307, %cst_97 {dimension_numbers = #tpu.dot_dimension_numbers<[1], [0], [0], [1], [0, 0, 1, 1], [], []>} : vector<16x16xf32>, vector<16x256xf32>, vector<16x256xf32> -> vector<16x256xf32>
    %311 = arith.addf %303, %310 : vector<16x256xf32>
    %c255_i32_98 = arith.constant 255 : i32
    %312 = tpu.dynamic_rotate %276 by %c255_i32_98 dim 1 : vector<16x256xf32>, i32 -> vector<16x256xf32>
    %313 = vector.extract_strided_slice %0 {offsets = [5, 0], sizes = [1, 256], strides = [1, 1]} : vector<9x256xf32> to vector<1x256xf32>
    %314 = vector.broadcast %313 : vector<1x256xf32> to vector<16x256xf32>
    %315 = arith.mulf %312, %314 : vector<16x256xf32>
    %316 = vector.extract_strided_slice %7 {offsets = [5, 0, 0], sizes = [1, 16, 16], strides = [1, 1, 1]} : vector<9x16x16xf32> to vector<1x16x16xf32>
    %317 = vector.shape_cast %316 : vector<1x16x16xf32> to vector<16x16xf32>
    %cst_99 = arith.constant dense<0.000000e+00> : vector<16x256xf32>
    %318 = tpu.matmul %317, %315, %cst_99 {dimension_numbers = #tpu.dot_dimension_numbers<[1], [0], [0], [1], [0, 0, 1, 1], [], []>} : vector<16x16xf32>, vector<16x256xf32>, vector<16x256xf32> -> vector<16x256xf32>
    %319 = arith.addf %311, %318 : vector<16x256xf32>
    %c241_i32_100 = arith.constant 241 : i32
    %320 = tpu.dynamic_rotate %276 by %c241_i32_100 dim 1 : vector<16x256xf32>, i32 -> vector<16x256xf32>
    %321 = vector.extract_strided_slice %0 {offsets = [6, 0], sizes = [1, 256], strides = [1, 1]} : vector<9x256xf32> to vector<1x256xf32>
    %322 = vector.broadcast %321 : vector<1x256xf32> to vector<16x256xf32>
    %323 = arith.mulf %320, %322 : vector<16x256xf32>
    %324 = vector.extract_strided_slice %7 {offsets = [6, 0, 0], sizes = [1, 16, 16], strides = [1, 1, 1]} : vector<9x16x16xf32> to vector<1x16x16xf32>
    %325 = vector.shape_cast %324 : vector<1x16x16xf32> to vector<16x16xf32>
    %cst_101 = arith.constant dense<0.000000e+00> : vector<16x256xf32>
    %326 = tpu.matmul %325, %323, %cst_101 {dimension_numbers = #tpu.dot_dimension_numbers<[1], [0], [0], [1], [0, 0, 1, 1], [], []>} : vector<16x16xf32>, vector<16x256xf32>, vector<16x256xf32> -> vector<16x256xf32>
    %327 = arith.addf %319, %326 : vector<16x256xf32>
    %c240_i32_102 = arith.constant 240 : i32
    %328 = tpu.dynamic_rotate %276 by %c240_i32_102 dim 1 : vector<16x256xf32>, i32 -> vector<16x256xf32>
    %329 = vector.extract_strided_slice %0 {offsets = [7, 0], sizes = [1, 256], strides = [1, 1]} : vector<9x256xf32> to vector<1x256xf32>
    %330 = vector.broadcast %329 : vector<1x256xf32> to vector<16x256xf32>
    %331 = arith.mulf %328, %330 : vector<16x256xf32>
    %332 = vector.extract_strided_slice %7 {offsets = [7, 0, 0], sizes = [1, 16, 16], strides = [1, 1, 1]} : vector<9x16x16xf32> to vector<1x16x16xf32>
    %333 = vector.shape_cast %332 : vector<1x16x16xf32> to vector<16x16xf32>
    %cst_103 = arith.constant dense<0.000000e+00> : vector<16x256xf32>
    %334 = tpu.matmul %333, %331, %cst_103 {dimension_numbers = #tpu.dot_dimension_numbers<[1], [0], [0], [1], [0, 0, 1, 1], [], []>} : vector<16x16xf32>, vector<16x256xf32>, vector<16x256xf32> -> vector<16x256xf32>
    %335 = arith.addf %327, %334 : vector<16x256xf32>
    %c239_i32_104 = arith.constant 239 : i32
    %336 = tpu.dynamic_rotate %276 by %c239_i32_104 dim 1 : vector<16x256xf32>, i32 -> vector<16x256xf32>
    %337 = vector.extract_strided_slice %0 {offsets = [8, 0], sizes = [1, 256], strides = [1, 1]} : vector<9x256xf32> to vector<1x256xf32>
    %338 = vector.broadcast %337 : vector<1x256xf32> to vector<16x256xf32>
    %339 = arith.mulf %336, %338 : vector<16x256xf32>
    %340 = vector.extract_strided_slice %7 {offsets = [8, 0, 0], sizes = [1, 16, 16], strides = [1, 1, 1]} : vector<9x16x16xf32> to vector<1x16x16xf32>
    %341 = vector.shape_cast %340 : vector<1x16x16xf32> to vector<16x16xf32>
    %cst_105 = arith.constant dense<0.000000e+00> : vector<16x256xf32>
    %342 = tpu.matmul %341, %339, %cst_105 {dimension_numbers = #tpu.dot_dimension_numbers<[1], [0], [0], [1], [0, 0, 1, 1], [], []>} : vector<16x16xf32>, vector<16x256xf32>, vector<16x256xf32> -> vector<16x256xf32>
    %343 = arith.addf %335, %342 : vector<16x256xf32>
    %cst_106 = arith.constant dense<0.000000e+00> : vector<16xf32>
    %344 = vector.multi_reduction <add>, %343, %cst_106 [1] : vector<16x256xf32> to vector<16xf32>
    %345 = vector.shape_cast %344 : vector<16xf32> to vector<16x1xf32>
    %cst_107 = arith.constant dense<0.000000e+00> : vector<16x1xf32>
    %346 = tpu.matmul %1, %345, %cst_107 {dimension_numbers = #tpu.dot_dimension_numbers<[1], [0], [0], [1], [0, 0, 1, 1], [], []>} : vector<16x16xf32>, vector<16x1xf32>, vector<16x1xf32> -> vector<16x1xf32>
    %347 = vector.broadcast %346 : vector<16x1xf32> to vector<16x256xf32>
    %348 = arith.subf %343, %347 : vector<16x256xf32>
    %349 = arith.mulf %348, %348 : vector<16x256xf32>
    %cst_108 = arith.constant dense<0.000000e+00> : vector<16xf32>
    %350 = vector.multi_reduction <add>, %349, %cst_108 [1] : vector<16x256xf32> to vector<16xf32>
    %351 = vector.shape_cast %350 : vector<16xf32> to vector<16x1xf32>
    %cst_109 = arith.constant dense<0.000000e+00> : vector<16x1xf32>
    %352 = tpu.matmul %1, %351, %cst_109 {dimension_numbers = #tpu.dot_dimension_numbers<[1], [0], [0], [1], [0, 0, 1, 1], [], []>} : vector<16x16xf32>, vector<16x1xf32>, vector<16x1xf32> -> vector<16x1xf32>
    %cst_110 = arith.constant 9.99999974E-6 : f32
    %353 = vector.broadcast %cst_110 : f32 to vector<16x1xf32>
    %354 = arith.addf %352, %353 : vector<16x1xf32>
    %355 = math.rsqrt %354 : vector<16x1xf32>
    %356 = arith.mulf %355, %4 : vector<16x1xf32>
    %357 = vector.broadcast %356 : vector<16x1xf32> to vector<16x256xf32>
    %358 = arith.mulf %348, %357 : vector<16x256xf32>
    %359 = vector.broadcast %5 : vector<16x1xf32> to vector<16x256xf32>
    %360 = arith.addf %358, %359 : vector<16x256xf32>
    %361 = arith.addf %360, %190 : vector<16x256xf32>
    %cst_111 = arith.constant 0.000000e+00 : f32
    %362 = vector.broadcast %cst_111 : f32 to vector<16x256xf32>
    %363 = arith.maximumf %361, %362 : vector<16x256xf32>
    %c1_112 = arith.constant 1 : index
    %c0_113 = arith.constant 0 : index
    %c0_114 = arith.constant 0 : index
    %364 = vector.load %arg11[%c1_112, %c0_113, %c0_114] : memref<2x16x256xf32, #tpu.memory_space<vmem>>, vector<1x16x256xf32>
    %365 = vector.shape_cast %364 : vector<1x16x256xf32> to vector<16x256xf32>
    %366 = vector.shape_cast %363 : vector<16x256xf32> to vector<1x16x256xf32>
    tpu.vector_store %arg11[%c1_112, %c0_113, %c0_114], %366 {strides = array<i32>} : memref<2x16x256xf32, #tpu.memory_space<vmem>>, vector<1x16x256xf32>,
    return
  }
  func.func @transform_0(%arg0: i32) -> (i32, i32, i32) {
    %c0_i32 = arith.constant 0 : i32
    %c0_i32_0 = arith.constant 0 : i32
    %c0_i32_1 = arith.constant 0 : i32
    return %arg0, %c0_i32, %c0_i32_0 : i32, i32, i32
  }
  func.func @transform_1(%arg0: i32) -> (i32, i32, i32) {
    %c0_i32 = arith.constant 0 : i32
    %c0_i32_0 = arith.constant 0 : i32
    %c0_i32_1 = arith.constant 0 : i32
    %c0_i32_2 = arith.constant 0 : i32
    return %c0_i32, %c0_i32_0, %c0_i32_1 : i32, i32, i32
  }
  func.func @transform_2(%arg0: i32) -> (i32, i32, i32) {
    %c0_i32 = arith.constant 0 : i32
    %c0_i32_0 = arith.constant 0 : i32
    %c0_i32_1 = arith.constant 0 : i32
    %c0_i32_2 = arith.constant 0 : i32
    return %c0_i32, %c0_i32_0, %c0_i32_1 : i32, i32, i32
  }
  func.func @transform_3(%arg0: i32) -> (i32, i32) {
    %c0_i32 = arith.constant 0 : i32
    %c0_i32_0 = arith.constant 0 : i32
    %c0_i32_1 = arith.constant 0 : i32
    return %c0_i32, %c0_i32_0 : i32, i32
  }
  func.func @transform_4(%arg0: i32) -> (i32, i32) {
    %c0_i32 = arith.constant 0 : i32
    %c0_i32_0 = arith.constant 0 : i32
    %c0_i32_1 = arith.constant 0 : i32
    return %c0_i32, %c0_i32_0 : i32, i32
  }
  func.func @transform_5(%arg0: i32) -> (i32, i32) {
    %c0_i32 = arith.constant 0 : i32
    %c0_i32_0 = arith.constant 0 : i32
    %c0_i32_1 = arith.constant 0 : i32
    return %c0_i32, %c0_i32_0 : i32, i32
  }
  func.func @transform_6(%arg0: i32) -> (i32, i32) {
    %c0_i32 = arith.constant 0 : i32
    %c0_i32_0 = arith.constant 0 : i32
    %c0_i32_1 = arith.constant 0 : i32
    return %c0_i32, %c0_i32_0 : i32, i32
  }
  func.func @transform_7(%arg0: i32) -> (i32, i32) {
    %c0_i32 = arith.constant 0 : i32
    %c0_i32_0 = arith.constant 0 : i32
    %c0_i32_1 = arith.constant 0 : i32
    return %c0_i32, %c0_i32_0 : i32, i32
  }
  func.func @transform_8(%arg0: i32) -> (i32, i32) {
    %c0_i32 = arith.constant 0 : i32
    %c0_i32_0 = arith.constant 0 : i32
    %c0_i32_1 = arith.constant 0 : i32
    return %c0_i32, %c0_i32_0 : i32, i32
  }
  func.func @transform_9(%arg0: i32) -> (i32, i32) {
    %c0_i32 = arith.constant 0 : i32
    %c0_i32_0 = arith.constant 0 : i32
    %c0_i32_1 = arith.constant 0 : i32
    return %c0_i32, %c0_i32_0 : i32, i32
  }
  func.func @transform_10(%arg0: i32) -> (i32, i32, i32) {
    %c0_i32 = arith.constant 0 : i32
    %c0_i32_0 = arith.constant 0 : i32
    %c0_i32_1 = arith.constant 0 : i32
    return %arg0, %c0_i32, %c0_i32_0 : i32, i32, i32
  }
}

</mosaic_0001>

<bundles_post_ra>
// kernel: conv_block.1
= control target key start
LH: loop header
LB: loop body
LE: loop exit
PB: predicated region body
PF: predicated region fallthrough
CT: control target
= control target key end

     0   :  { %v6469_v1 = vmov 0.0   ;;  %s5178_s15 = smov 17   ;;  %s5179_s16 = smov 16   ;;  %vm97_vm0 = vcmask 1043456   ;;  %v184_v3 = vlaneseq  ;;  %vm90_vm3 = vcmask 31744   ;;  %s6458_s0 = inlined_call_operand.vmem [shape: f32[2,4,256], index: 0, kind: input, shape index: {}]   ;;  %s6459_s9 = inlined_call_operand.vmem [shape: f32[9,256], index: 9, kind: input, shape index: {}]   ;;  %s6460_s1 = inlined_call_operand.vmem [shape: f32[9,16,4], index: 1, kind: input, shape index: {}]   ;;  %s6461_s3 = inlined_call_operand.vmem [shape: f32[16,4], index: 3, kind: input, shape index: {}]   ;;  %s6462_s4 = inlined_call_operand.vmem [shape: f32[16,16], index: 4, kind: input, shape index: {}]   ;;  %s6463_s6 = inlined_call_operand.vmem [shape: f32[16,1], index: 6, kind: input, shape index: {}]   ;;  %s6464_s5 = inlined_call_operand.vmem [shape: f32[16,1], index: 5, kind: input, shape index: {}]   ;;  %s6465_s2 = inlined_call_operand.vmem [shape: f32[9,16,16], index: 2, kind: input, shape index: {}]   ;;  %s6466_s7 = inlined_call_operand.vmem [shape: f32[16,1], index: 7, kind: input, shape index: {}]   ;;  %s6467_s8 = inlined_call_operand.vmem [shape: f32[16,1], index: 8, kind: input, shape index: {}]   ;;  %s6468_s10 = inlined_call_operand.vmem [shape: f32[2,16,256], index: 10, kind: output, shape index: {}]  }
   0x1   :  { %v5245_v0 = vld [vmem:[%s6458_s0] sm:$0xff]  ;;  %275 = vmatprep.mubr.f32.mxu1 %v6469_v1  ;;  %166 = vmatprep.mubr.f32.mxu0 %v6469_v1  ;;  %s5180_s17 = smov 15   ;;  %s5181_s18 = smov 1   ;;  %v5286_v7 = vld [vmem:[%s6459_s9 + $0x8] sm:$0xff]  ;;  %v5384_v44 = vld [vmem:[%s6460_s1 + $0x10] sm:$0xff]  ;;  %vm1147_vm10 = vcmask 130048  }
   0x2   :  { %180 = vrot.lane.b32.xlu0 %v5245_v0, %s5178_s15  ;;  %v89_v2 = vcombine.high %v5245_v0, %v5245_v0  ;;  %371 = vrot.lane.b32.xlu1 %v5245_v0, %s5179_s16  ;;  %s5182_s19 = smov 127   ;;  %s5183_s20 = smov 113   ;;  %v5278_v4 = vshrl.u32 %v184_v3, 7  ;;  %v5280_v5 = vand.u32 127, %v184_v3  ;;  %v5291_v8 = vld [vmem:[%s6459_s9] sm:$0xff]  ;;  %v5333_v28 = vld [vmem:[%s6460_s1 + $0x8] sm:$0xff] }
   0x3   :  { %s5184_s21 = smov 112   ;;  %s5185_s22 = smov 111   ;;  %v5316_v22 = vld [vmem:[%s6460_s1] sm:$0xff]  ;;  %v5364_v38 = vld [vmem:[%s6460_s1 + $0x48] sm:$0xff]  ;;  %v5395_v49 = vld [vmem:[%s6460_s1 + $0x18] sm:$0xff] }
   0x4   :  { %4684 = vmatprep.subr.msk.mxu0 %vm97_vm0, %v89_v2  ;;  %v191_v6 = vsub.s32 0, %v5278_v4  ;;  %v380_v11 = vsub.s32 1, %v5278_v4  ;;  %vm186_vm1 = vcmp.lt.s32.totalorder %v5280_v5, 17  ;;  %vm375_vm2 = vcmp.lt.s32.totalorder %v5280_v5, 16  ;;  %v5352_v33 = vld [vmem:[%s6460_s1 + $0x40] sm:$0xff]  ;;  %v5427_v60 = vld [vmem:[%s6460_s1 + $0x28] sm:$0xff] }
   0x5   :  { %4685 = vmatpush1.msk.msra.mxu0 %vm97_vm0, %v5245_v0  ;;  %v490_v24 = vsub.s32 2, %v5278_v4  ;;  %vm485_vm4 = vcmp.lt.s32.totalorder %v5280_v5, 15  ;;  %v600_v35 = vsub.s32 3, %v5278_v4  ;;  %vm595_vm5 = vcmp.lt.s32.totalorder %v5280_v5, 1  ;;  %v5416_v55 = vld [vmem:[%s6460_s1 + $0x20] sm:$0xff]  ;;  %v5448_v3 = vld [vmem:[%s6460_s1 + $0x30] sm:$0xff] }
   0x6   :  { %182 = vrot.lane.b32.xlu0 %v89_v2, %s5178_s15  ;;  %373 = vrot.lane.b32.xlu1 %v89_v2, %s5179_s16  ;;  %v5296_v12 = vrot.slane %v5286_v7, %v191_v6  ;;  %v5299_v13 = vrot.slane %v5291_v8, %v191_v6  ;;  %v5303_v15 = vrot.slane %v5286_v7, %v380_v11  ;;  %v710_v46 = vsub.s32 5, %v5278_v4 }
   0x7   :  { %v5327_v27 = vrot.slane %v5291_v8, %v380_v11  ;;  %v5341_v30 = vrot.slane %v5286_v7, %v490_v24  ;;  %v5367_v39 = vrot.slane %v5291_v8, %v490_v24  ;;  %v5373_v41 = vrot.slane %v5286_v7, %v600_v35  ;;  %v5490_v24 = vld [vmem:[%s6460_s1 + $0x58] sm:$0xff] }
   0x8   :  { %vm705_vm6 = vcmp.lt.s32.totalorder %v5280_v5, 127  ;;  %v5399_v50 = vrot.slane %v5291_v8, %v600_v35  ;;  %v5405_v52 = vrot.slane %v5286_v7, %v710_v46  ;;  %v820_v57 = vsub.s32 6, %v5278_v4  ;;  %v5522_v35 = vld [vmem:[%s6460_s1 + $0x68] sm:$0xff] }
   0x9   :  { %vm815_vm7 = vcmp.lt.s32.totalorder %v5280_v5, 113  ;;  %v5431_v61 = vrot.slane %v5291_v8, %v710_v46  ;;  %vm925_vm8 = vcmp.lt.s32.totalorder %v5280_v5, 112  ;;  %vm1035_vm9 = vcmp.lt.s32.totalorder %v5280_v5, 111  ;;  %v5565_v46 = vld [vmem:[%s6460_s1 + $0x88] sm:$0xff] }
   0xa   :  { %483 = vrot.lane.b32.xlu1 %v89_v2, %s5180_s17  ;;  %481 = vrot.lane.b32.xlu0 %v5245_v0, %s5180_s17  ;;  %v5437_v63 = vrot.slane %v5286_v7, %v820_v57 }
   0xe   :  { %593 = vrot.lane.b32.xlu1 %v89_v2, %s5181_s18  ;;  %591 = vrot.lane.b32.xlu0 %v5245_v0, %s5181_s18 }
  0x12   :  { %703 = vrot.lane.b32.xlu1 %v89_v2, %s5182_s19  ;;  %701 = vrot.lane.b32.xlu0 %v5245_v0, %s5182_s19 }
  0x16   :  { %813 = vrot.lane.b32.xlu1 %v89_v2, %s5183_s20  ;;  %811 = vrot.lane.b32.xlu0 %v5245_v0, %s5183_s20 }
  0x1a   :  { %923 = vrot.lane.b32.xlu1 %v89_v2, %s5184_s21  ;;  %921 = vrot.lane.b32.xlu0 %v5245_v0, %s5184_s21 }
  0x1e   :  { %1033 = vrot.lane.b32.xlu1 %v89_v2, %s5185_s22  ;;  %1031 = vrot.lane.b32.xlu0 %v5245_v0, %s5185_s22 }
  0x74   :  { %v181_v9 = vpop.permute.xlu0 %180  ;;  %v372_v10 = vpop.permute.xlu1 %371 }
  0x78   :  { %v183_v14 = vpop.permute.xlu0 %182  ;;  %v374_v16 = vpop.permute.xlu1 %373 }
  0x79   :  { %v188_v17 = vsel %vm186_vm1, %v183_v14, %v181_v9  ;;  %v187_v18 = vsel %vm186_vm1, %v181_v9, %v183_v14  ;;  %v376_v19 = vsel %vm375_vm2, %v372_v10, %v374_v16  ;;  %v377_v29 = vsel %vm375_vm2, %v374_v16, %v372_v10  ;;  %v5459_v14 = vld [vmem:[%s6460_s1 + $0x38] sm:$0xff] }
  0x7a   :  { %v198_v20 = vmul.f32 %v5296_v12, %v187_v18  ;;  %v197_v21 = vmul.f32 %v5299_v13, %v188_v17  ;;  %v387_v23 = vmul.f32 %v5303_v15, %v376_v19  ;;  %v386_v32 = vmul.f32 %v5327_v27, %v377_v29  ;;  %v5502_v29 = vld [vmem:[%s6459_s9 + $0x18] ss:$0 sm:$0xff] }
  0x7b   :  { %v930_v9 = vsub.s32 7, %v5278_v4  ;;  %v5463_v16 = vrot.slane %v5291_v8, %v820_v57  ;;  %v5572_v57 = vld [vmem:[%s6461_s3] sm:$0xff] }
  0x7c   :  { %4688 = vmatprep.subr.msk.mxu1 %vm97_vm0, %v198_v20  ;;  %v484_v25 = vpop.permute.xlu1 %483  ;;  %v482_v26 = vpop.permute.xlu0 %481  ;;  %v5480_v20 = vld [vmem:[%s6460_s1 + $0x50] sm:$0xff]  ;;  %4686 = vmatmul.mubr.msk.f32.vlgmr.msra.gmra.mrb[0].mxu0 %vm90_vm3, %v5572_v57 }
  0x7d   :  { %4689 = vmatpush1.msk.msra.mxu1 %vm97_vm0, %v197_v21  ;;  %v486_v31 = vsel %vm485_vm4, %v482_v26, %v484_v25  ;;  %v487_v40 = vsel %vm485_vm4, %v484_v25, %v482_v26  ;;  %v5469_v17 = vrot.slane %v5286_v7, %v930_v9  ;;  %v5494_v25 = vrot.slane %v5291_v8, %v930_v9  ;;  %v5596_v9 = vld [vmem:[%s6462_s4 + $0x8] sm:$0xff] }
  0x7e   :  { %4690 = vmatmul.mubr.msk.f32.vlgmr.msra.gmra.mrb[0].mxu1 %vm90_vm3, %v5316_v22  ;;  %4692 = vmatprep.subr.msk.mxu1 %vm97_vm0, %v89_v2  ;;  %v497_v34 = vmul.f32 %v5341_v30, %v486_v31  ;;  %v496_v43 = vmul.f32 %v5367_v39, %v487_v40 }
  0x7f   :  { %281 = vmatprep.mubr.f32.mxu1 %v6469_v1  ;;  %4693 = vmatpush1.msk.msra.mxu1 %vm97_vm0, %v5245_v0 }
  0x80   :  { %4696 = vmatprep.subr.msk.mxu1 %vm97_vm0, %v387_v23  ;;  %v594_v36 = vpop.permute.xlu1 %593  ;;  %v592_v37 = vpop.permute.xlu0 %591  ;;  %172 = vmatprep.mubr.f32.mxu0 %v6469_v1 }
  0x81   :  { %v596_v42 = vsel %vm595_vm5, %v592_v37, %v594_v36  ;;  %v597_v51 = vsel %vm595_vm5, %v594_v36, %v592_v37  ;;  %v5528_v36 = vld [vmem:[%s6459_s9 + $0x10] ss:$0 sm:$0xff] }
  0x82   :  { %4691 = vmatmul.mubr.msk.f32.gmra.mrb[2].mxu1 %vm90_vm3, %v5333_v28  ;;  %v607_v45 = vmul.f32 %v5373_v41, %v596_v42  ;;  %v606_v54 = vmul.f32 %v5399_v50, %v597_v51  ;;  %v5540_v42 = vld [vmem:[%s6460_s1 + $0x70] sm:$0xff] }
  0x83   :  { %358 = vmatprep.mubr.f32.mxu1 %v6469_v1 }
  0x84   :  { %v704_v47 = vpop.permute.xlu1 %703  ;;  %v702_v48 = vpop.permute.xlu0 %701 }
  0x85   :  { %v707_v53 = vsel %vm705_vm6, %v704_v47, %v702_v48  ;;  %v706_v62 = vsel %vm705_vm6, %v702_v48, %v704_v47 }
  0x86   :  { %4694 = vmatmul.mubr.msk.f32.vlgmr.msra.gmra.mrb[0].mxu1 %vm90_vm3, %v5352_v33  ;;  %v717_v56 = vmul.f32 %v5405_v52, %v707_v53  ;;  %v716_v2 = vmul.f32 %v5431_v61, %v706_v62  ;;  %v5186_v62 = vmov 0  }
  0x87   :  { %4697 = vmatpush1.msk.msra.mxu1 %vm97_vm0, %v386_v32  ;;  %364 = vmatprep.mubr.f32.mxu1 %v6469_v1  ;;  %v5513_v32 = vld [vmem:[%s6460_s1 + $0x60] sm:$0xff] }
  0x88   :  { %4700 = vmatprep.subr.msk.mxu1 %vm97_vm0, %v497_v34  ;;  %v814_v58 = vpop.permute.xlu1 %813  ;;  %v812_v59 = vpop.permute.xlu0 %811  ;;  %5154 = vset.pattern.permute.xlu1 %v5186_v62 }
  0x89   :  { %v817_v0 = vsel %vm815_vm7, %v814_v58, %v812_v59  ;;  %v816_v4 = vsel %vm815_vm7, %v812_v59, %v814_v58  ;;  %v5580_v58 = vld [vmem:[%s6461_s3 + $0x8] sm:$0xff]  ;;  %v5587_v59 = vld [vmem:[%s6462_s4] sm:$0xff]  ;;  %5153 = vset.pattern.permute.xlu0 %v5186_v62 }
  0x8a   :  { %4695 = vmatmul.mubr.msk.f32.gmra.mrb[2].mxu1 %vm90_vm3, %v5364_v38  ;;  %v827_v6 = vmul.f32 %v5437_v63, %v817_v0  ;;  %v826_v19 = vmul.f32 %v5463_v16, %v816_v4  ;;  %4687 = vmatmul.mubr.msk.f32.gmra.mrb[2].mxu0 %vm90_vm3, %v5580_v58 }
  0x8b   :  { %464 = vmatprep.mubr.f32.mxu1 %v6469_v1  ;;  %4859 = vmatprep.mubr.msk.f32.mxu0 %vm1147_vm10, %v5587_v59 }
  0x8c   :  { %v924_v10 = vpop.permute.xlu1 %923  ;;  %v922_v11 = vpop.permute.xlu0 %921 }
  0x8d   :  { %v927_v18 = vsel %vm925_vm8, %v924_v10, %v922_v11  ;;  %v926_v26 = vsel %vm925_vm8, %v922_v11, %v924_v10 }
  0x8e   :  { %4698 = vmatmul.mubr.msk.f32.vlgmr.msra.gmra.mrb[0].mxu1 %vm90_vm3, %v5384_v44  ;;  %v937_v21 = vmul.f32 %v5469_v17, %v927_v18  ;;  %v936_v8 = vmul.f32 %v5494_v25, %v926_v26 }
  0x8f   :  { %470 = vmatprep.mubr.f32.mxu1 %v6469_v1  ;;  %4701 = vmatpush1.msk.msra.mxu1 %vm97_vm0, %v496_v43  ;;  %v5548_v43 = vld [vmem:[%s6460_s1 + $0x78] sm:$0xff] }
  0x90   :  { %4704 = vmatprep.subr.msk.mxu1 %vm97_vm0, %v607_v45  ;;  %v1034_v7 = vpop.permute.xlu1 %1033  ;;  %v1032_v23 = vpop.permute.xlu0 %1031  ;;  %v5557_v45 = vld [vmem:[%s6460_s1 + $0x80] sm:$0xff] }
  0x91   :  { %v1037_v31 = vsel %vm1035_vm9, %v1034_v7, %v1032_v23  ;;  %v1036_v37 = vsel %vm1035_vm9, %v1032_v23, %v1034_v7 }
  0x92   :  { %4699 = vmatmul.mubr.msk.f32.gmra.mrb[2].mxu1 %vm90_vm3, %v5395_v49  ;;  %v1047_v34 = vmul.f32 %v5502_v29, %v1037_v31  ;;  %v1046_v40 = vmul.f32 %v5528_v36, %v1036_v37 }
  0x93   :  { %574 = vmatprep.mubr.f32.mxu1 %v6469_v1 }
  0x96   :  { %4702 = vmatmul.mubr.msk.f32.vlgmr.msra.gmra.mrb[0].mxu1 %vm90_vm3, %v5416_v55 }
  0x97   :  { %580 = vmatprep.mubr.f32.mxu1 %v6469_v1  ;;  %4705 = vmatpush1.msk.msra.mxu1 %vm97_vm0, %v606_v54 }
  0x98   :  { %4708 = vmatprep.subr.msk.mxu1 %vm97_vm0, %v717_v56 }
  0x9a   :  { %4703 = vmatmul.mubr.msk.f32.gmra.mrb[2].mxu1 %vm90_vm3, %v5427_v60 }
  0x9b   :  { %684 = vmatprep.mubr.f32.mxu1 %v6469_v1 }
  0x9e   :  { %4706 = vmatmul.mubr.msk.f32.vlgmr.msra.gmra.mrb[0].mxu1 %vm90_vm3, %v5448_v3 }
  0x9f   :  { %690 = vmatprep.mubr.f32.mxu1 %v6469_v1  ;;  %4709 = vmatpush1.msk.msra.mxu1 %vm97_vm0, %v716_v2 }
  0xa0   :  { %4712 = vmatprep.subr.msk.mxu1 %vm97_vm0, %v827_v6 }
  0xa2   :  { %4707 = vmatmul.mubr.msk.f32.gmra.mrb[2].mxu1 %vm90_vm3, %v5459_v14 }
  0xa3   :  { %794 = vmatprep.mubr.f32.mxu1 %v6469_v1 }
  0xa6   :  { %4710 = vmatmul.mubr.msk.f32.vlgmr.msra.gmra.mrb[0].mxu1 %vm90_vm3, %v5480_v20 }
  0xa7   :  { %800 = vmatprep.mubr.f32.mxu1 %v6469_v1  ;;  %4713 = vmatpush1.msk.msra.mxu1 %vm97_vm0, %v826_v19 }
  0xa8   :  { %4716 = vmatprep.subr.msk.mxu1 %vm97_vm0, %v937_v21 }
  0xaa   :  { %4711 = vmatmul.mubr.msk.f32.gmra.mrb[2].mxu1 %vm90_vm3, %v5490_v24 }
  0xab   :  { %904 = vmatprep.mubr.f32.mxu1 %v6469_v1 }
  0xae   :  { %4714 = vmatmul.mubr.msk.f32.vlgmr.msra.gmra.mrb[0].mxu1 %vm90_vm3, %v5513_v32 }
  0xaf   :  { %910 = vmatprep.mubr.f32.mxu1 %v6469_v1  ;;  %4717 = vmatpush1.msk.msra.mxu1 %vm97_vm0, %v936_v8 }
  0xb0   :  { %4722 = vmatprep.subr.msk.mxu1 %vm97_vm0, %v1047_v34 }
  0xb2   :  { %4715 = vmatmul.mubr.msk.f32.gmra.mrb[2].mxu1 %vm90_vm3, %v5522_v35 }
  0xb3   :  { %1014 = vmatprep.mubr.f32.mxu1 %v6469_v1 }
  0xb6   :  { %4718 = vmatmul.mubr.msk.f32.vlgmr.msra.gmra.mrb[0].mxu1 %vm90_vm3, %v5540_v42 }
  0xb7   :  { %1020 = vmatprep.mubr.f32.mxu1 %v6469_v1  ;;  %4723 = vmatpush1.msk.msra.mxu1 %vm97_vm0, %v1046_v40 }
  0xba   :  { %4719 = vmatmul.mubr.msk.f32.gmra.mrb[2].mxu1 %vm90_vm3, %v5548_v43 }
  0xbb   :  { %1124 = vmatprep.mubr.f32.mxu1 %v6469_v1 }
  0xbe   :  { %4724 = vmatmul.mubr.msk.f32.vlgmr.msra.gmra.mrb[0].mxu1 %vm90_vm3, %v5557_v45 }
  0xbf   :  { %1130 = vmatprep.mubr.f32.mxu1 %v6469_v1 }
  0xc2   :  { %4725 = vmatmul.mubr.msk.f32.gmra.mrb[2].mxu1 %vm90_vm3, %v5565_v46 }
  0xc3   :  { %4873 = vmatprep.mubr.msk.f32.mxu1 %vm1147_vm10, %v5587_v59 }
 0x14f   :  { %v5602_v10 = vpop.f32.mrb[0].mxu0 }
 0x150   :  { %6487 = vst [vmem:[#allocation2_spill] sm:$0xff] %v5602_v10  ;;  %v5604_v11 = vpop.f32.mrb[1].mxu0 }
 0x151   :  { %6488 = vst [vmem:[#allocation3_spill] sm:$0xff] %v5604_v11 }
 0x15d   :  { %v5606_v4 = vpop.f32.mrb[2].mxu0 }
 0x15e   :  { %6489 = vst [vmem:[#allocation4_spill] sm:$0xff] %v5606_v4  ;;  %v5608_v18 = vpop.f32.mrb[3].mxu0 }
 0x15f   :  { %6490 = vst [vmem:[#allocation5_spill] sm:$0xff] %v5608_v18 }
 0x191   :  { %v1126_v47 = vpop.f32.mrb[0].mxu1 }
 0x192   :  { %v1128_v48 = vpop.f32.mrb[1].mxu1 }
 0x193   :  { %v1141_v51 = vadd.f32 %v1128_v48, %v1126_v47 }
 0x195   :  { %1142 = vadd.xlane.f32.xlu0 %v1141_v51  ;;  %v1132_v53 = vpop.f32.mrb[2].mxu1 }
 0x196   :  { %v1134_v54 = vpop.f32.mrb[3].mxu1 }
 0x197   :  { %v1144_v56 = vadd.f32 %v1134_v54, %v1132_v53 }
 0x199   :  { %1145 = vadd.xlane.f32.xlu1 %v1144_v56 }
 0x222   :  { %v1143_v0 = vpop.xlane.xlu0 %1142 }
 0x226   :  { %v1146_v2 = vpop.xlane.xlu1 %1145 }
 0x227   :  { %v4911_v6 = vpack.c.bf16 %v1146_v2, %v1143_v0  ;;  %v43_v2 = vld [vmem:[%s6463_s6] sm:$0xff] }
 0x229   :  { %4912 = vmatprep.subr.bf16.mxu0 %v4911_v6 }
 0x22a   :  { %4914 = vmatpush3.bf16.msra.mxu0 %v4911_v6 }
 0x22d   :  { %4860 = vmatmul.mubr.msk.f32.vlgmr.msra.gmra.mrb[4].mxu0 %vm1147_vm10, %v5596_v9 }
 0x22e   :  { %4866 = vmatprep.mubr.msk.f32.mxu0 %vm1147_vm10, %v5587_v59 }
 0x300   :  { %v4861_v19 = vpop.f32.mrb[4].mxu0 }
 0x301   :  { %1236 = vperm.xlu1 %5154, %v4861_v19   ;;  %v1220_v21 = vpop.f32.mrb[5].mxu0 }
 0x302   :  { %1231 = vperm.xlu0 %5153, %v1220_v21  }
 0x380   :  { %v1237_v7 = vpop.permute.xlu1 %1236 }
 0x381   :  { %v1241_v23 = vsub.f32 %v1132_v53, %v1237_v7  ;;  %v1242_v26 = vsub.f32 %v1134_v54, %v1237_v7  ;;  %v1232_v31 = vpop.permute.xlu0 %1231  ;;  %v5619_v7 = vld [vmem:[%s6464_s5 + $0x8] sm:$0xff] }
 0x382   :  { %v1239_v8 = vsub.f32 %v1126_v47, %v1232_v31  ;;  %v1240_v34 = vsub.f32 %v1128_v48, %v1232_v31  ;;  %v5624_v31 = vld [vmem:[%s6464_s5] sm:$0xff] }
 0x383   :  { %v1245_v37 = vmul.f32 %v1241_v23, %v1241_v23  ;;  %v1246_v40 = vmul.f32 %v1242_v26, %v1242_v26  ;;  %6491 = vst [vmem:[#allocation6_spill] sm:$0xff] %v5624_v31 }
 0x384   :  { %v1243_v51 = vmul.f32 %v1239_v8, %v1239_v8  ;;  %v1244_v56 = vmul.f32 %v1240_v34, %v1240_v34 }
 0x385   :  { %v1250_v62 = vadd.f32 %v1246_v40, %v1245_v37 }
 0x386   :  { %v1247_v0 = vadd.f32 %v1244_v56, %v1243_v51 }
 0x387   :  { %1251 = vadd.xlane.f32.xlu0 %v1250_v62  ;;  %v44_v62 = vld [vmem:[%s6463_s6 + $0x8] sm:$0xff] }
 0x388   :  { %1248 = vadd.xlane.f32.xlu1 %v1247_v0 }
 0x399   :  { %1348 = vperm.xlu1 %5154, %v43_v2  }
 0x414   :  { %v1252_v6 = vpop.xlane.xlu0 %1251 }
 0x415   :  { %v1249_v19 = vpop.xlane.xlu1 %1248 }
 0x416   :  { %v4915_v53 = vpack.c.bf16 %v1252_v6, %v1249_v19 }
 0x418   :  { %4916 = vmatprep.subr.bf16.mxu0 %v4915_v53 }
 0x419   :  { %4918 = vmatpush3.bf16.msra.mxu0 %v4915_v53  ;;  %v5631_v0 = vpop.permute.xlu1 %1348 }
 0x41a   :  { %6492 = vst [vmem:[#allocation7_spill] sm:$0xff] %v5631_v0 }
 0x41c   :  { %4867 = vmatmul.mubr.msk.f32.vlgmr.msra.gmra.mrb[6].mxu0 %vm1147_vm10, %v5596_v9 }
 0x41d   :  { %1450 = vmatprep.mubr.f32.mxu0 %v6469_v1 }
 0x4ef   :  { %v4868_v47 = vpop.f32.mrb[6].mxu0 }
 0x4f0   :  { %v1325_v48 = vadd.f32 1e-05, %v4868_v47  ;;  %v1319_v54 = vpop.f32.mrb[7].mxu0 }
 0x4f1   :  { %v1320_v21 = vadd.f32 1e-05, %v1319_v54 }
 0x4f2   :  { %5157 = vrsqrt.f32 %v1325_v48 }
 0x4f3   :  { %5159 = vrsqrt.f32 %v1320_v21 }
 0x4fc   :  { %v5158_v37 = vpop.eup %5157 }
 0x4fd   :  { %v5160_v40 = vpop.eup %5159  ;;  %v1331_v51 = vmul.f32 %v5158_v37, %v5619_v7 }
 0x4fe   :  { %v1330_v56 = vmul.f32 %v5160_v40, %v5624_v31 }
 0x4ff   :  { %1339 = vperm.xlu0 %5153, %v1331_v51  }
 0x500   :  { %1334 = vperm.xlu1 %5154, %v1330_v56  }
 0x504   :  { %1353 = vperm.xlu1 %5154, %v44_v62  }
 0x57e   :  { %v1340_v2 = vpop.permute.xlu0 %1339 }
 0x57f   :  { %v1335_v6 = vpop.permute.xlu1 %1334  ;;  %v1344_v47 = vmul.f32 %v1340_v2, %v1241_v23 }
 0x580   :  { %v1342_v19 = vmul.f32 %v1335_v6, %v1239_v8  ;;  %v1343_v53 = vmul.f32 %v1335_v6, %v1240_v34  ;;  %v1345_v8 = vmul.f32 %v1340_v2, %v1242_v26 }
 0x582   :  { %v1356_v48 = vadd.f32 %v5631_v0, %v1342_v19  ;;  %v1357_v21 = vadd.f32 %v5631_v0, %v1343_v53 }
 0x583   :  { %v5634_v54 = vpop.permute.xlu1 %1353 }
 0x584   :  { %6493 = vst [vmem:[#allocation8_spill] sm:$0xff] %v5634_v54  ;;  %v5637_v37 = vmax.f32 %v1356_v48, 0.0  ;;  %v1358_v40 = vadd.f32 %v5634_v54, %v1344_v47  ;;  %v5644_v56 = vmax.f32 %v1357_v21, 0.0  ;;  %v1359_v34 = vadd.f32 %v5634_v54, %v1345_v8 }
 0x586   :  { %v5640_v51 = vmax.f32 %v1358_v40, 0.0  ;;  %1546 = vrot.lane.b32.xlu0 %v5637_v37, %s5179_s16  ;;  %v1363_v62 = vmax.f32 %v1359_v34, 0.0 }
 0x588   :  { %1366 = vrot.lane.b32.xlu1 %v5640_v51, %s5178_s15  ;;  %v4923_v31 = vpack.c.bf16 %v1363_v62, %v5644_v56 }
 0x58a   :  { %1550 = vrot.lane.b32.xlu0 %v5644_v56, %s5179_s16 }
 0x58c   :  { %1364 = vrot.lane.b32.xlu1 %v5637_v37, %s5178_s15 }
 0x58e   :  { %1649 = vrot.lane.b32.xlu0 %v5637_v37, %s5180_s17 }
 0x590   :  { %1368 = vrot.lane.b32.xlu1 %v5644_v56, %s5178_s15 }
 0x592   :  { %1653 = vrot.lane.b32.xlu0 %v5644_v56, %s5180_s17 }
 0x594   :  { %1370 = vrot.lane.b32.xlu1 %v1363_v62, %s5178_s15 }
 0x596   :  { %1752 = vrot.lane.b32.xlu0 %v5637_v37, %s5181_s18 }
 0x598   :  { %1548 = vrot.lane.b32.xlu1 %v5640_v51, %s5179_s16 }
 0x59a   :  { %1756 = vrot.lane.b32.xlu0 %v5644_v56, %s5181_s18 }
 0x59c   :  { %1552 = vrot.lane.b32.xlu1 %v1363_v62, %s5179_s16 }
 0x59e   :  { %1855 = vrot.lane.b32.xlu0 %v5637_v37, %s5182_s19 }
 0x5a0   :  { %1651 = vrot.lane.b32.xlu1 %v5640_v51, %s5180_s17 }
 0x5a2   :  { %1859 = vrot.lane.b32.xlu0 %v5644_v56, %s5182_s19 }
 0x5a4   :  { %1655 = vrot.lane.b32.xlu1 %v1363_v62, %s5180_s17 }
 0x5a6   :  { %1958 = vrot.lane.b32.xlu0 %v5637_v37, %s5183_s20 }
 0x5a8   :  { %1754 = vrot.lane.b32.xlu1 %v5640_v51, %s5181_s18 }
 0x5aa   :  { %1962 = vrot.lane.b32.xlu0 %v5644_v56, %s5183_s20 }
 0x5ac   :  { %1758 = vrot.lane.b32.xlu1 %v1363_v62, %s5181_s18 }
 0x5ae   :  { %2061 = vrot.lane.b32.xlu0 %v5637_v37, %s5184_s21 }
 0x5b0   :  { %1857 = vrot.lane.b32.xlu1 %v5640_v51, %s5182_s19 }
 0x5b2   :  { %2065 = vrot.lane.b32.xlu0 %v5644_v56, %s5184_s21 }
 0x5b4   :  { %1861 = vrot.lane.b32.xlu1 %v1363_v62, %s5182_s19 }
 0x5b6   :  { %2164 = vrot.lane.b32.xlu0 %v5637_v37, %s5185_s22 }
 0x5b8   :  { %1960 = vrot.lane.b32.xlu1 %v5640_v51, %s5183_s20 }
 0x5ba   :  { %2168 = vrot.lane.b32.xlu0 %v5644_v56, %s5185_s22 }
 0x5bc   :  { %1964 = vrot.lane.b32.xlu1 %v1363_v62, %s5183_s20 }
 0x5c0   :  { %2063 = vrot.lane.b32.xlu1 %v5640_v51, %s5184_s21 }
 0x5c4   :  { %2067 = vrot.lane.b32.xlu1 %v1363_v62, %s5184_s21 }
 0x5c8   :  { %2166 = vrot.lane.b32.xlu1 %v5640_v51, %s5185_s22 }
 0x5cc   :  { %2170 = vrot.lane.b32.xlu1 %v1363_v62, %s5185_s22  ;;  %v5742_v62 = vld [vmem:[%s6465_s2 + $0x8] sm:$0xff] }
 0x5f8   :  { %v1547_v26 = vpop.permute.xlu0 %1546 }
 0x5fa   :  { %v1367_v2 = vpop.permute.xlu1 %1366 }
 0x5fc   :  { %v1551_v6 = vpop.permute.xlu0 %1550 }
 0x5fe   :  { %v1365_v19 = vpop.permute.xlu1 %1364 }
 0x600   :  { %v1650_v53 = vpop.permute.xlu0 %1649 }
 0x602   :  { %v1369_v47 = vpop.permute.xlu1 %1368 }
 0x603   :  { %v1372_v21 = vsel %vm186_vm1, %v1365_v19, %v1369_v47  ;;  %v1374_v40 = vsel %vm186_vm1, %v1369_v47, %v1365_v19 }
 0x604   :  { %v1654_v48 = vpop.permute.xlu0 %1653  ;;  %v1376_v23 = vmul.f32 %v1374_v40, %v5299_v13  ;;  %v1377_v11 = vmul.f32 %v1372_v21, %v5296_v12  ;;  %v5723_v21 = vld [vmem:[%s6465_s2] sm:$0xff] }
 0x606   :  { %v1371_v8 = vpop.permute.xlu1 %1370 }
 0x607   :  { %v1373_v34 = vsel %vm186_vm1, %v1367_v2, %v1371_v8  ;;  %v1375_v1 = vsel %vm186_vm1, %v1371_v8, %v1367_v2  ;;  %v1554_v2 = vsel %vm375_vm2, %v1547_v26, %v1551_v6 }
 0x608   :  { %v1378_v10 = vmul.f32 %v1375_v1, %v5299_v13  ;;  %v1379_v18 = vmul.f32 %v1373_v34, %v5296_v12  ;;  %v5715_v4 = vpop.permute.xlu0 %1752 }
 0x60a   :  { %v4921_v0 = vpack.c.bf16 %v1378_v10, %v1376_v23  ;;  %v1549_v54 = vpop.permute.xlu1 %1548  ;;  %v4919_v19 = vpack.c.bf16 %v1379_v18, %v1377_v11  ;;  %v1559_v11 = vmul.f32 %v1554_v2, %v5303_v15 }
 0x60c   :  { %v1757_v47 = vpop.permute.xlu0 %1756  ;;  %4920 = vmatprep.subr.bf16.mxu0 %v4919_v19  ;;  %v5756_v19 = vld [vmem:[%s6465_s2 + $0x40] sm:$0xff] }
 0x60d   :  { %4922 = vmatpush1.bf16.msra.mxu0 %v4921_v0  ;;  %v6494_v0 = vpack.c.bf16 %v5640_v51, %v5637_v37  ;;  %v1657_v51 = vsel %vm485_vm4, %v1650_v53, %v1654_v48 }
 0x60e   :  { %4924 = vmatprep.subr.bf16.mxu0 %v4923_v31  ;;  %v1553_v1 = vpop.permute.xlu1 %1552  ;;  %v6495_v31 = vmov 0.0  }
 0x60f   :  { %v1555_v10 = vsel %vm375_vm2, %v1549_v54, %v1553_v1  ;;  %v1557_v18 = vsel %vm375_vm2, %v1553_v1, %v1549_v54  ;;  %v1556_v54 = vsel %vm375_vm2, %v1551_v6, %v1547_v26 }
 0x610   :  { %v1561_v56 = vmul.f32 %v1555_v10, %v5303_v15  ;;  %v5731_v23 = vpop.permute.xlu0 %1855  ;;  %4730 = vmatmul.mubr.msk.f32.vlgmr.msra.gmra.mrb[8].mxu0 %vm1147_vm10, %v5723_v21  ;;  %v1560_v34 = vmul.f32 %v1557_v18, %v5327_v27  ;;  %v1558_v37 = vmul.f32 %v1556_v54, %v5327_v27  ;;  %v1662_v10 = vmul.f32 %v1657_v51, %v5341_v30 }
 0x611   :  { %4926 = vmatpush1.bf16.msra.mxu0 %v6494_v0  ;;  %1456 = vmatprep.mubr.f32.mxu0 %v6495_v31  ;;  %v1659_v0 = vsel %vm485_vm4, %v1654_v48, %v1650_v53  ;;  %v1760_v51 = vsel %vm595_vm5, %v5715_v4, %v1757_v47  ;;  %v5785_v53 = vld [vmem:[%s6465_s2 + $0x10] sm:$0xff] }
 0x612   :  { %v1652_v40 = vpop.permute.xlu1 %1651  ;;  %v4927_v8 = vpack.c.bf16 %v1561_v56, %v1559_v11  ;;  %v4929_v2 = vpack.c.bf16 %v1560_v34, %v1558_v37  ;;  %v5770_v56 = vld [vmem:[%s6465_s2 + $0x48] sm:$0xff]  ;;  %v1661_v37 = vmul.f32 %v1659_v0, %v5367_v39  ;;  %v1762_v0 = vsel %vm595_vm5, %v1757_v47, %v5715_v4  ;;  %v5815_v4 = vld [vmem:[%s6465_s2 + $0x20] sm:$0xff] }
 0x614   :  { %4731 = vmatmul.mubr.msk.f32.gmra.mrb[10].mxu0 %vm1147_vm10, %v5742_v62  ;;  %4928 = vmatprep.subr.bf16.mxu0 %v4927_v8  ;;  %v1860_v26 = vpop.permute.xlu0 %1859 }
 0x615   :  { %1533 = vmatprep.mubr.f32.mxu0 %v6495_v31 }
 0x616   :  { %v1656_v6 = vpop.permute.xlu1 %1655 }
 0x617   :  { %v1658_v1 = vsel %vm485_vm4, %v1652_v40, %v1656_v6  ;;  %v1660_v11 = vsel %vm485_vm4, %v1656_v6, %v1652_v40 }
 0x618   :  { %v1664_v18 = vmul.f32 %v1658_v1, %v5341_v30  ;;  %4732 = vmatmul.mubr.msk.f32.vlgmr.msra.gmra.mrb[8].mxu0 %vm1147_vm10, %v5756_v19  ;;  %v1663_v40 = vmul.f32 %v1660_v11, %v5367_v39  ;;  %v1959_v34 = vpop.permute.xlu0 %1958  ;;  %v1765_v1 = vmul.f32 %v1760_v51, %v5373_v41  ;;  %v1764_v51 = vmul.f32 %v1762_v0, %v5399_v50 }
 0x619   :  { %4930 = vmatpush1.bf16.msra.mxu0 %v4929_v2  ;;  %1539 = vmatprep.mubr.f32.mxu0 %v6495_v31 }
 0x61a   :  { %v1755_v54 = vpop.permute.xlu1 %1754  ;;  %v4931_v8 = vpack.c.bf16 %v1664_v18, %v1662_v10  ;;  %v4933_v6 = vpack.c.bf16 %v1663_v40, %v1661_v37  ;;  %v5799_v18 = vld [vmem:[%s6465_s2 + $0x18] sm:$0xff] }
 0x61c   :  { %4733 = vmatmul.mubr.msk.f32.gmra.mrb[10].mxu0 %vm1147_vm10, %v5770_v56  ;;  %4932 = vmatprep.subr.bf16.mxu0 %v4931_v8  ;;  %v1963_v8 = vpop.permute.xlu0 %1962 }
 0x61d   :  { %1632 = vmatprep.mubr.f32.mxu0 %v6495_v31 }
 0x61e   :  { %v1759_v48 = vpop.permute.xlu1 %1758 }
 0x61f   :  { %v1761_v2 = vsel %vm595_vm5, %v1755_v54, %v1759_v48  ;;  %v1763_v10 = vsel %vm595_vm5, %v1759_v48, %v1755_v54  ;;  %v1865_v48 = vsel %vm705_vm6, %v1860_v26, %v5731_v23 }
 0x620   :  { %v1767_v11 = vmul.f32 %v1761_v2, %v5373_v41  ;;  %4734 = vmatmul.mubr.msk.f32.vlgmr.msra.gmra.mrb[8].mxu0 %vm1147_vm10, %v5785_v53  ;;  %v1766_v37 = vmul.f32 %v1763_v10, %v5399_v50  ;;  %v2062_v10 = vpop.permute.xlu0 %2061 }
 0x621   :  { %4934 = vmatpush1.bf16.msra.mxu0 %v4933_v6  ;;  %1638 = vmatprep.mubr.f32.mxu0 %v6495_v31 }
 0x622   :  { %v1858_v40 = vpop.permute.xlu1 %1857  ;;  %v4935_v54 = vpack.c.bf16 %v1767_v11, %v1765_v1  ;;  %v4937_v6 = vpack.c.bf16 %v1766_v37, %v1764_v51  ;;  %v1868_v1 = vmul.f32 %v1865_v48, %v5405_v52  ;;  %v1863_v37 = vsel %vm705_vm6, %v5731_v23, %v1860_v26 }
 0x624   :  { %4735 = vmatmul.mubr.msk.f32.gmra.mrb[10].mxu0 %vm1147_vm10, %v5799_v18  ;;  %4936 = vmatprep.subr.bf16.mxu0 %v4935_v54  ;;  %v5829_v54 = vld [vmem:[%s6465_s2 + $0x28] sm:$0xff]  ;;  %v2066_v23 = vpop.permute.xlu0 %2065 }
 0x625   :  { %1735 = vmatprep.mubr.f32.mxu0 %v6495_v31  ;;  %6496 = vst [vmem:[#allocation9_spill] sm:$0xff] %v5829_v54 }
 0x626   :  { %v1862_v47 = vpop.permute.xlu1 %1861 }
 0x627   :  { %v1866_v2 = vsel %vm705_vm6, %v1862_v47, %v1858_v40  ;;  %v1864_v11 = vsel %vm705_vm6, %v1858_v40, %v1862_v47  ;;  %v1867_v47 = vmul.f32 %v1863_v37, %v5431_v61 }
 0x628   :  { %v1870_v0 = vmul.f32 %v1866_v2, %v5405_v52  ;;  %4736 = vmatmul.mubr.msk.f32.vlgmr.msra.gmra.mrb[8].mxu0 %vm1147_vm10, %v5815_v4  ;;  %v1869_v40 = vmul.f32 %v1864_v11, %v5431_v61  ;;  %v5844_v2 = vld [vmem:[%s6465_s2 + $0x30] sm:$0xff] }
 0x629   :  { %4938 = vmatpush1.bf16.msra.mxu0 %v4937_v6  ;;  %1741 = vmatprep.mubr.f32.mxu0 %v6495_v31  ;;  %v1968_v6 = vsel %vm815_vm7, %v1963_v8, %v1959_v34  ;;  %6497 = vst [vmem:[#allocation10_spill] sm:$0xff] %v5844_v2 }
 0x62a   :  { %v1961_v51 = vpop.permute.xlu1 %1960  ;;  %v4939_v48 = vpack.c.bf16 %v1870_v0, %v1868_v1  ;;  %v4941_v1 = vpack.c.bf16 %v1869_v40, %v1867_v47  ;;  %v1971_v0 = vmul.f32 %v1968_v6, %v5437_v63  ;;  %v5858_v40 = vld [vmem:[%s6465_s2 + $0x38] sm:$0xff]  ;;  %v1966_v47 = vsel %vm815_vm7, %v1959_v34, %v1963_v8  ;;  %v5872_v34 = vld [vmem:[%s6465_s2 + $0x50] sm:$0xff] }
 0x62b   :  { %6498 = vst [vmem:[#allocation11_spill] sm:$0xff] %v5858_v40  ;;  %6499 = vst [vmem:[#allocation12_spill] sm:$0xff] %v5872_v34 }
 0x62c   :  { %4737 = vmatmul.mubr.msk.f32.gmra.mrb[10].mxu0 %vm1147_vm10, %v5829_v54  ;;  %4940 = vmatprep.subr.bf16.mxu0 %v4939_v48 }
 0x62d   :  { %1838 = vmatprep.mubr.f32.mxu0 %v6495_v31 }
 0x62e   :  { %v1965_v26 = vpop.permute.xlu1 %1964 }
 0x62f   :  { %v1969_v11 = vsel %vm815_vm7, %v1965_v26, %v1961_v51  ;;  %v1967_v37 = vsel %vm815_vm7, %v1961_v51, %v1965_v26  ;;  %v2165_v26 = vpop.permute.xlu0 %2164 }
 0x630   :  { %v1973_v48 = vmul.f32 %v1969_v11, %v5437_v63  ;;  %4738 = vmatmul.mubr.msk.f32.vlgmr.msra.gmra.mrb[8].mxu0 %vm1147_vm10, %v5844_v2  ;;  %v1972_v51 = vmul.f32 %v1967_v37, %v5463_v16  ;;  %v2071_v11 = vsel %vm925_vm8, %v2066_v23, %v2062_v10 }
 0x631   :  { %4942 = vmatpush1.bf16.msra.mxu0 %v4941_v1  ;;  %1844 = vmatprep.mubr.f32.mxu0 %v6495_v31  ;;  %v1970_v1 = vmul.f32 %v1966_v47, %v5463_v16 }
 0x632   :  { %v2064_v6 = vpop.permute.xlu1 %2063  ;;  %v4943_v54 = vpack.c.bf16 %v1973_v48, %v1971_v0  ;;  %v2074_v48 = vmul.f32 %v2071_v11, %v5469_v17 }
 0x633   :  { %v4945_v0 = vpack.c.bf16 %v1972_v51, %v1970_v1  ;;  %v5886_v51 = vld [vmem:[%s6465_s2 + $0x58] sm:$0xff]  ;;  %v2069_v1 = vsel %vm925_vm8, %v2062_v10, %v2066_v23  ;;  %v2169_v11 = vpop.permute.xlu0 %2168  ;;  %v5900_v10 = vld [vmem:[%s6465_s2 + $0x60] sm:$0xff] }
 0x634   :  { %4739 = vmatmul.mubr.msk.f32.gmra.mrb[10].mxu0 %vm1147_vm10, %v5858_v40  ;;  %4944 = vmatprep.subr.bf16.mxu0 %v4943_v54  ;;  %6500 = vst [vmem:[#allocation13_spill] sm:$0xff] %v5886_v51  ;;  %6501 = vst [vmem:[#allocation14_spill] sm:$0xff] %v5900_v10 }
 0x635   :  { %1941 = vmatprep.mubr.f32.mxu0 %v6495_v31 }
 0x636   :  { %v2068_v8 = vpop.permute.xlu1 %2067 }
 0x637   :  { %v2072_v37 = vsel %vm925_vm8, %v2068_v8, %v2064_v6  ;;  %v2070_v54 = vsel %vm925_vm8, %v2064_v6, %v2068_v8  ;;  %v2073_v8 = vmul.f32 %v2069_v1, %v5494_v25  ;;  %v5914_v1 = vld [vmem:[%s6465_s2 + $0x68] sm:$0xff] }
 0x638   :  { %v2076_v47 = vmul.f32 %v2072_v37, %v5469_v17  ;;  %4740 = vmatmul.mubr.msk.f32.vlgmr.msra.gmra.mrb[8].mxu0 %vm1147_vm10, %v5872_v34  ;;  %v2075_v6 = vmul.f32 %v2070_v54, %v5494_v25  ;;  %6502 = vst [vmem:[#allocation15_spill] sm:$0xff] %v5914_v1 }
 0x639   :  { %4946 = vmatpush1.bf16.msra.mxu0 %v4945_v0  ;;  %1947 = vmatprep.mubr.f32.mxu0 %v6495_v31  ;;  %v2174_v0 = vsel %vm1035_vm9, %v2169_v11, %v2165_v26 }
 0x63a   :  { %v2167_v40 = vpop.permute.xlu1 %2166  ;;  %v4947_v2 = vpack.c.bf16 %v2076_v47, %v2074_v48  ;;  %v4949_v37 = vpack.c.bf16 %v2075_v6, %v2073_v8  ;;  %v2177_v54 = vmul.f32 %v5502_v29, %v2174_v0  ;;  %v2172_v6 = vsel %vm1035_vm9, %v2165_v26, %v2169_v11  ;;  %v5934_v26 = vld [vmem:[%s6465_s2 + $0x78] sm:$0xff]  ;;  %v5942_v11 = vld [vmem:[%s6465_s2 + $0x80] sm:$0xff] }
 0x63b   :  { %6504 = vst [vmem:[#allocation17_spill] sm:$0xff] %v5934_v26  ;;  %6505 = vst [vmem:[#allocation18_spill] sm:$0xff] %v5942_v11 }
 0x63c   :  { %4741 = vmatmul.mubr.msk.f32.gmra.mrb[10].mxu0 %vm1147_vm10, %v5886_v51  ;;  %4948 = vmatprep.subr.bf16.mxu0 %v4947_v2 }
 0x63d   :  { %2044 = vmatprep.mubr.f32.mxu0 %v6495_v31 }
 0x63e   :  { %v2171_v23 = vpop.permute.xlu1 %2170 }
 0x63f   :  { %v2175_v48 = vsel %vm1035_vm9, %v2171_v23, %v2167_v40  ;;  %v2173_v2 = vsel %vm1035_vm9, %v2167_v40, %v2171_v23  ;;  %v2176_v40 = vmul.f32 %v5528_v36, %v2172_v6  ;;  %v5926_v23 = vld [vmem:[%s6465_s2 + $0x70] sm:$0xff] }
 0x640   :  { %v2179_v47 = vmul.f32 %v5502_v29, %v2175_v48  ;;  %4742 = vmatmul.mubr.msk.f32.vlgmr.msra.gmra.mrb[8].mxu0 %vm1147_vm10, %v5900_v10  ;;  %v2178_v0 = vmul.f32 %v5528_v36, %v2173_v2  ;;  %6503 = vst [vmem:[#allocation16_spill] sm:$0xff] %v5926_v23  ;;  %v5950_v48 = vld [vmem:[%s6465_s2 + $0x88] sm:$0xff] }
 0x641   :  { %4950 = vmatpush1.bf16.msra.mxu0 %v4949_v37  ;;  %2050 = vmatprep.mubr.f32.mxu0 %v6495_v31  ;;  %6506 = vst [vmem:[#allocation19_spill] sm:$0xff] %v5950_v48 }
 0x642   :  { %v4951_v8 = vpack.c.bf16 %v2179_v47, %v2177_v54  ;;  %v4953_v37 = vpack.c.bf16 %v2178_v0, %v2176_v40  ;;  %v5970_v40 = vld [vmem:[%s6458_s0 + $0x8] sm:$0xff]  ;;  %v6518_v5 = vld [vmem:[#allocation17_spill] sm:$0xff] }
 0x644   :  { %4743 = vmatmul.mubr.msk.f32.gmra.mrb[10].mxu0 %vm1147_vm10, %v5914_v1  ;;  %4952 = vmatprep.subr.bf16.mxu0 %v4951_v8 }
 0x645   :  { %2147 = vmatprep.mubr.f32.mxu0 %v6495_v31 }
 0x648   :  { %4744 = vmatmul.mubr.msk.f32.vlgmr.msra.gmra.mrb[8].mxu0 %vm1147_vm10, %v5926_v23 }
 0x649   :  { %4954 = vmatpush1.bf16.msra.mxu0 %v4953_v37  ;;  %2153 = vmatprep.mubr.f32.mxu0 %v6495_v31  ;;  %v5974_v37 = vcombine.high %v5970_v40, %v5970_v40 }
 0x64c   :  { %4745 = vmatmul.mubr.msk.f32.gmra.mrb[10].mxu0 %vm1147_vm10, %v5934_v26 }
 0x64d   :  { %2250 = vmatprep.mubr.f32.mxu0 %v6495_v31 }
 0x650   :  { %4746 = vmatmul.mubr.msk.f32.vlgmr.msra.gmra.mrb[8].mxu0 %vm1147_vm10, %v5942_v11 }
 0x651   :  { %2256 = vmatprep.mubr.f32.mxu0 %v6495_v31 }
 0x654   :  { %4747 = vmatmul.mubr.msk.f32.gmra.mrb[10].mxu0 %vm1147_vm10, %v5950_v48 }
 0x655   :  { %2655 = vmatprep.mubr.f32.mxu0 %v6495_v31 }
 0x723   :  { %v5955_v54 = vpop.f32.mrb[8].mxu0 }
 0x724   :  { %v5957_v2 = vpop.f32.mrb[9].mxu0 }
 0x725   :  { %v2267_v47 = vadd.f32 %v5957_v2, %v5955_v54 }
 0x727   :  { %2268 = vadd.xlane.f32.xlu0 %v2267_v47  ;;  %v5961_v6 = vpop.f32.mrb[10].mxu0 }
 0x728   :  { %v5963_v8 = vpop.f32.mrb[11].mxu0 }
 0x729   :  { %v2270_v0 = vadd.f32 %v5963_v8, %v5961_v6 }
 0x72b   :  { %2271 = vadd.xlane.f32.xlu1 %v2270_v0 }
 0x73c   :  { %2579 = vrot.lane.b32.xlu1 %v5974_v37, %s5178_s15 }
 0x73d   :  { %2577 = vrot.lane.b32.xlu0 %v5970_v40, %s5178_s15 }
 0x740   :  { %2747 = vrot.lane.b32.xlu1 %v5974_v37, %s5179_s16 }
 0x741   :  { %2745 = vrot.lane.b32.xlu0 %v5970_v40, %s5179_s16 }
 0x744   :  { %2842 = vrot.lane.b32.xlu1 %v5974_v37, %s5180_s17 }
 0x745   :  { %2840 = vrot.lane.b32.xlu0 %v5970_v40, %s5180_s17 }
 0x748   :  { %2937 = vrot.lane.b32.xlu1 %v5974_v37, %s5181_s18 }
 0x749   :  { %2935 = vrot.lane.b32.xlu0 %v5970_v40, %s5181_s18 }
 0x74c   :  { %3032 = vrot.lane.b32.xlu1 %v5974_v37, %s5182_s19 }
 0x74d   :  { %3030 = vrot.lane.b32.xlu0 %v5970_v40, %s5182_s19 }
 0x750   :  { %3127 = vrot.lane.b32.xlu1 %v5974_v37, %s5183_s20 }
 0x751   :  { %3125 = vrot.lane.b32.xlu0 %v5970_v40, %s5183_s20 }
 0x754   :  { %3222 = vrot.lane.b32.xlu1 %v5974_v37, %s5184_s21 }
 0x755   :  { %3220 = vrot.lane.b32.xlu0 %v5970_v40, %s5184_s21 }
 0x758   :  { %3317 = vrot.lane.b32.xlu1 %v5974_v37, %s5185_s22 }
 0x759   :  { %3315 = vrot.lane.b32.xlu0 %v5970_v40, %s5185_s22 }
 0x7b4   :  { %v2269_v47 = vpop.xlane.xlu0 %2268 }
 0x7b8   :  { %v2272_v0 = vpop.xlane.xlu1 %2271  ;;  %v2578_v11 = vpop.permute.xlu0 %2577 }
 0x7b9   :  { %v4955_v48 = vpack.c.bf16 %v2272_v0, %v2269_v47 }
 0x7bb   :  { %4956 = vmatprep.subr.bf16.mxu1 %v4955_v48 }
 0x7bc   :  { %4958 = vmatpush3.bf16.msra.mxu1 %v4955_v48  ;;  %v2580_v26 = vpop.permute.xlu1 %2579  ;;  %v2746_v34 = vpop.permute.xlu0 %2745 }
 0x7bd   :  { %v2581_v23 = vsel %vm186_vm1, %v2578_v11, %v2580_v26  ;;  %v2582_v1 = vsel %vm186_vm1, %v2580_v26, %v2578_v11 }
 0x7be   :  { %v2583_v10 = vmul.f32 %v2582_v1, %v5299_v13  ;;  %v2584_v51 = vmul.f32 %v2581_v23, %v5296_v12 }
 0x7bf   :  { %4874 = vmatmul.mubr.msk.f32.vlgmr.msra.gmra.mrb[4].mxu1 %vm1147_vm10, %v5596_v9 }
 0x7c0   :  { %4757 = vmatprep.subr.msk.mxu0 %vm97_vm0, %v2584_v51  ;;  %v2748_v47 = vpop.permute.xlu1 %2747  ;;  %4880 = vmatprep.mubr.msk.f32.mxu1 %vm1147_vm10, %v5587_v59  ;;  %v2841_v23 = vpop.permute.xlu0 %2840 }
 0x7c1   :  { %4758 = vmatpush1.msk.msra.mxu0 %vm97_vm0, %v2583_v10  ;;  %v2749_v48 = vsel %vm375_vm2, %v2746_v34, %v2748_v47  ;;  %v2750_v51 = vsel %vm375_vm2, %v2748_v47, %v2746_v34 }
 0x7c2   :  { %4759 = vmatmul.mubr.msk.f32.vlgmr.msra.gmra.mrb[12].mxu0 %vm90_vm3, %v5316_v22  ;;  %4761 = vmatprep.subr.msk.mxu0 %vm97_vm0, %v5974_v37  ;;  %v2752_v1 = vmul.f32 %v2749_v48, %v5303_v15  ;;  %v2751_v26 = vmul.f32 %v2750_v51, %v5327_v27 }
 0x7c3   :  { %2661 = vmatprep.mubr.f32.mxu0 %v6495_v31  ;;  %4762 = vmatpush1.msk.msra.mxu0 %vm97_vm0, %v5970_v40 }
 0x7c4   :  { %4765 = vmatprep.subr.msk.mxu0 %vm97_vm0, %v2752_v1  ;;  %v2843_v10 = vpop.permute.xlu1 %2842  ;;  %v2936_v0 = vpop.permute.xlu0 %2935 }
 0x7c5   :  { %v2844_v22 = vsel %vm485_vm4, %v2841_v23, %v2843_v10  ;;  %v2845_v47 = vsel %vm485_vm4, %v2843_v10, %v2841_v23 }
 0x7c6   :  { %4760 = vmatmul.mubr.msk.f32.gmra.mrb[14].mxu0 %vm90_vm3, %v5333_v28  ;;  %v2847_v11 = vmul.f32 %v2844_v22, %v5341_v30 }
 0x7c7   :  { %2732 = vmatprep.mubr.f32.mxu0 %v6495_v31 }
 0x7c8   :  { %v2938_v34 = vpop.permute.xlu1 %2937  ;;  %v3031_v1 = vpop.permute.xlu0 %3030 }
 0x7c9   :  { %v2939_v28 = vsel %vm595_vm5, %v2936_v0, %v2938_v34  ;;  %v2940_v23 = vsel %vm595_vm5, %v2938_v34, %v2936_v0 }
 0x7ca   :  { %4763 = vmatmul.mubr.msk.f32.vlgmr.msra.gmra.mrb[12].mxu0 %vm90_vm3, %v5352_v33  ;;  %v2846_v33 = vmul.f32 %v2845_v47, %v5367_v39  ;;  %v2942_v48 = vmul.f32 %v2939_v28, %v5373_v41 }
 0x7cb   :  { %2738 = vmatprep.mubr.f32.mxu0 %v6495_v31  ;;  %4766 = vmatpush1.msk.msra.mxu0 %vm97_vm0, %v2751_v26 }
 0x7cc   :  { %4769 = vmatprep.subr.msk.mxu0 %vm97_vm0, %v2847_v11  ;;  %v3033_v51 = vpop.permute.xlu1 %3032  ;;  %v3126_v22 = vpop.permute.xlu0 %3125 }
 0x7cd   :  { %v3034_v11 = vsel %vm705_vm6, %v3031_v1, %v3033_v51 }
 0x7ce   :  { %4764 = vmatmul.mubr.msk.f32.gmra.mrb[14].mxu0 %vm90_vm3, %v5364_v38  ;;  %v3035_v38 = vsel %vm705_vm6, %v3033_v51, %v3031_v1 }
 0x7cf   :  { %2823 = vmatprep.mubr.f32.mxu0 %v6495_v31  ;;  %v3037_v10 = vmul.f32 %v3035_v38, %v5405_v52 }
 0x7d0   :  { %v3128_v26 = vpop.permute.xlu1 %3127  ;;  %v3221_v34 = vpop.permute.xlu0 %3220 }
 0x7d1   :  { %v3129_v28 = vsel %vm815_vm7, %v3126_v22, %v3128_v26 }
 0x7d2   :  { %4767 = vmatmul.mubr.msk.f32.vlgmr.msra.gmra.mrb[12].mxu0 %vm90_vm3, %v5384_v44  ;;  %v2941_v44 = vmul.f32 %v2940_v23, %v5399_v50 }
 0x7d3   :  { %2829 = vmatprep.mubr.f32.mxu0 %v6495_v31  ;;  %4770 = vmatpush1.msk.msra.mxu0 %vm97_vm0, %v2846_v33 }
 0x7d4   :  { %4773 = vmatprep.subr.msk.mxu0 %vm97_vm0, %v2942_v48  ;;  %v3223_v47 = vpop.permute.xlu1 %3222  ;;  %v3316_v48 = vpop.permute.xlu0 %3315 }
 0x7d5   :  { %v3224_v51 = vsel %vm925_vm8, %v3221_v34, %v3223_v47 }
 0x7d6   :  { %4768 = vmatmul.mubr.msk.f32.gmra.mrb[14].mxu0 %vm90_vm3, %v5395_v49  ;;  %v3130_v49 = vsel %vm815_vm7, %v3128_v26, %v3126_v22 }
 0x7d7   :  { %2918 = vmatprep.mubr.f32.mxu0 %v6495_v31  ;;  %v3132_v0 = vmul.f32 %v3130_v49, %v5437_v63 }
 0x7d8   :  { %v3318_v1 = vpop.permute.xlu1 %3317 }
 0x7d9   :  { %v3319_v38 = vsel %vm1035_vm9, %v3316_v48, %v3318_v1 }
 0x7da   :  { %4771 = vmatmul.mubr.msk.f32.vlgmr.msra.gmra.mrb[12].mxu0 %vm90_vm3, %v5416_v55  ;;  %v3036_v55 = vmul.f32 %v3034_v11, %v5431_v61 }
 0x7db   :  { %2924 = vmatprep.mubr.f32.mxu0 %v6495_v31  ;;  %4774 = vmatpush1.msk.msra.mxu0 %vm97_vm0, %v2941_v44 }
 0x7dc   :  { %4777 = vmatprep.subr.msk.mxu0 %vm97_vm0, %v3037_v10 }
 0x7de   :  { %4772 = vmatmul.mubr.msk.f32.gmra.mrb[14].mxu0 %vm90_vm3, %v5427_v60  ;;  %v3225_v60 = vsel %vm925_vm8, %v3223_v47, %v3221_v34 }
 0x7df   :  { %3013 = vmatprep.mubr.f32.mxu0 %v6495_v31  ;;  %v3227_v33 = vmul.f32 %v3225_v60, %v5469_v17 }
 0x7e2   :  { %4775 = vmatmul.mubr.msk.f32.vlgmr.msra.gmra.mrb[12].mxu0 %vm90_vm3, %v5448_v3  ;;  %v3131_v3 = vmul.f32 %v3129_v28, %v5463_v16 }
 0x7e3   :  { %3019 = vmatprep.mubr.f32.mxu0 %v6495_v31  ;;  %4778 = vmatpush1.msk.msra.mxu0 %vm97_vm0, %v3036_v55 }
 0x7e4   :  { %4781 = vmatprep.subr.msk.mxu0 %vm97_vm0, %v3132_v0 }
 0x7e6   :  { %4776 = vmatmul.mubr.msk.f32.gmra.mrb[14].mxu0 %vm90_vm3, %v5459_v14  ;;  %v3320_v14 = vsel %vm1035_vm9, %v3318_v1, %v3316_v48 }
 0x7e7   :  { %3108 = vmatprep.mubr.f32.mxu0 %v6495_v31  ;;  %v3322_v23 = vmul.f32 %v5502_v29, %v3320_v14 }
 0x7ea   :  { %4779 = vmatmul.mubr.msk.f32.vlgmr.msra.gmra.mrb[12].mxu0 %vm90_vm3, %v5480_v20  ;;  %v3226_v20 = vmul.f32 %v3224_v51, %v5494_v25 }
 0x7eb   :  { %3114 = vmatprep.mubr.f32.mxu0 %v6495_v31  ;;  %4782 = vmatpush1.msk.msra.mxu0 %vm97_vm0, %v3131_v3 }
 0x7ec   :  { %4785 = vmatprep.subr.msk.mxu0 %vm97_vm0, %v3227_v33 }
 0x7ee   :  { %4780 = vmatmul.mubr.msk.f32.gmra.mrb[14].mxu0 %vm90_vm3, %v5490_v24  ;;  %v3321_v24 = vmul.f32 %v5528_v36, %v3319_v38 }
 0x7ef   :  { %3203 = vmatprep.mubr.f32.mxu0 %v6495_v31 }
 0x7f2   :  { %4783 = vmatmul.mubr.msk.f32.vlgmr.msra.gmra.mrb[12].mxu0 %vm90_vm3, %v5513_v32 }
 0x7f3   :  { %3209 = vmatprep.mubr.f32.mxu0 %v6495_v31  ;;  %4786 = vmatpush1.msk.msra.mxu0 %vm97_vm0, %v3226_v20 }
 0x7f4   :  { %4789 = vmatprep.subr.msk.mxu0 %vm97_vm0, %v3322_v23 }
 0x7f6   :  { %4784 = vmatmul.mubr.msk.f32.gmra.mrb[14].mxu0 %vm90_vm3, %v5522_v35 }
 0x7f7   :  { %3298 = vmatprep.mubr.f32.mxu0 %v6495_v31 }
 0x7fa   :  { %4787 = vmatmul.mubr.msk.f32.vlgmr.msra.gmra.mrb[12].mxu0 %vm90_vm3, %v5540_v42 }
 0x7fb   :  { %3304 = vmatprep.mubr.f32.mxu0 %v6495_v31  ;;  %4790 = vmatpush1.msk.msra.mxu0 %vm97_vm0, %v3321_v24 }
 0x7fe   :  { %4788 = vmatmul.mubr.msk.f32.gmra.mrb[14].mxu0 %vm90_vm3, %v5548_v43 }
 0x7ff   :  { %3393 = vmatprep.mubr.f32.mxu0 %v6495_v31 }
 0x802   :  { %4791 = vmatmul.mubr.msk.f32.vlgmr.msra.gmra.mrb[12].mxu0 %vm90_vm3, %v5557_v45 }
 0x803   :  { %3399 = vmatprep.mubr.f32.mxu0 %v6495_v31 }
 0x806   :  { %4792 = vmatmul.mubr.msk.f32.gmra.mrb[14].mxu0 %vm90_vm3, %v5565_v46 }
 0x807   :  { %4901 = vmatprep.mubr.msk.f32.mxu0 %vm1147_vm10, %v5587_v59 }
 0x892   :  { %v4875_v29 = vpop.f32.mrb[4].mxu1 }
 0x893   :  { %2355 = vperm.xlu1 %5154, %v4875_v29   ;;  %v2339_v32 = vpop.f32.mrb[5].mxu1 }
 0x894   :  { %2350 = vperm.xlu0 %5153, %v2339_v32  }
 0x8d5   :  { %v3395_v35 = vpop.f32.mrb[12].mxu0 }
 0x8d6   :  { %v3397_v36 = vpop.f32.mrb[13].mxu0 }
 0x8d7   :  { %v3410_v42 = vadd.f32 %v3397_v36, %v3395_v35 }
 0x8d9   :  { %v3401_v43 = vpop.f32.mrb[14].mxu0 }
 0x8da   :  { %v3403_v44 = vpop.f32.mrb[15].mxu0 }
 0x8db   :  { %v3413_v10 = vadd.f32 %v3403_v44, %v3401_v43 }
 0x912   :  { %v2356_v22 = vpop.permute.xlu1 %2355 }
 0x913   :  { %v6136_v45 = vsub.f32 %v5961_v6, %v2356_v22  ;;  %v6139_v26 = vsub.f32 %v5963_v8, %v2356_v22  ;;  %v2351_v46 = vpop.permute.xlu0 %2350 }
 0x914   :  { %v6142_v11 = vsub.f32 %v5955_v54, %v2351_v46  ;;  %v6145_v49 = vsub.f32 %v5957_v2, %v2351_v46 }
 0x915   :  { %v2364_v55 = vmul.f32 %v6136_v45, %v6136_v45  ;;  %v2365_v0 = vmul.f32 %v6139_v26, %v6139_v26 }
 0x916   :  { %v2362_v6 = vmul.f32 %v6142_v11, %v6142_v11  ;;  %v2363_v8 = vmul.f32 %v6145_v49, %v6145_v49 }
 0x917   :  { %v2369_v34 = vadd.f32 %v2365_v0, %v2364_v55 }
 0x918   :  { %v2366_v47 = vadd.f32 %v2363_v8, %v2362_v6 }
 0x919   :  { %2370 = vadd.xlane.f32.xlu1 %v2369_v34 }
 0x91a   :  { %2367 = vadd.xlane.f32.xlu0 %v2366_v47 }
 0x91e   :  { %3411 = vadd.xlane.f32.xlu0 %v3410_v42 }
 0x922   :  { %3414 = vadd.xlane.f32.xlu0 %v3413_v10 }
 0x9a6   :  { %v2371_v54 = vpop.xlane.xlu1 %2370 }
 0x9a7   :  { %v2368_v2 = vpop.xlane.xlu0 %2367 }
 0x9a8   :  { %v4959_v28 = vpack.c.bf16 %v2371_v54, %v2368_v2  ;;  %v6507_v2 = vld [vmem:[#allocation6_spill] sm:$0xff] }
 0x9aa   :  { %4960 = vmatprep.subr.bf16.mxu1 %v4959_v28 }
 0x9ab   :  { %v3412_v60 = vpop.xlane.xlu0 %3411  ;;  %4962 = vmatpush3.bf16.msra.mxu1 %v4959_v28 }
 0x9ac   :  { %4753 = vmatprep.subr.msk.mxu1 %vm97_vm0, %v5974_v37 }
 0x9ae   :  { %4881 = vmatmul.mubr.msk.f32.vlgmr.msra.gmra.mrb[6].mxu1 %vm1147_vm10, %v5596_v9 }
 0x9af   :  { %v3415_v3 = vpop.xlane.xlu0 %3414  ;;  %4754 = vmatpush1.msk.msra.mxu1 %vm97_vm0, %v5970_v40  ;;  %2563 = vmatprep.mubr.f32.mxu1 %v6495_v31 }
 0x9b0   :  { %v4963_v33 = vpack.c.bf16 %v3415_v3, %v3412_v60 }
 0x9b2   :  { %4755 = vmatmul.mubr.msk.f32.vlgmr.msra.gmra.mrb[8].mxu1 %vm90_vm3, %v5572_v57  ;;  %4964 = vmatprep.subr.bf16.mxu1 %v4963_v33 }
 0x9b3   :  { %4966 = vmatpush3.bf16.msra.mxu1 %v4963_v33  ;;  %2569 = vmatprep.mubr.f32.mxu1 %v6495_v31 }
 0x9b6   :  { %4756 = vmatmul.mubr.msk.f32.gmra.mrb[10].mxu1 %vm90_vm3, %v5580_v58 }
 0x9b7   :  { %4887 = vmatprep.mubr.msk.f32.mxu1 %vm1147_vm10, %v5587_v59 }
 0x9ba   :  { %4888 = vmatmul.mubr.msk.f32.vlgmr.msra.gmra.mrb[12].mxu1 %vm1147_vm10, %v5596_v9 }
 0x9bb   :  { %4894 = vmatprep.mubr.msk.f32.mxu1 %vm1147_vm10, %v5587_v59 }
 0xa81   :  { %v6173_v40 = vpop.f32.mrb[6].mxu1 }
 0xa82   :  { %v6175_v37 = vpop.f32.mrb[7].mxu1 }
 0xa85   :  { %v6177_v57 = vpop.f32.mrb[8].mxu1 }
 0xa86   :  { %v6179_v48 = vpop.f32.mrb[9].mxu1 }
 0xa89   :  { %v6181_v1 = vpop.f32.mrb[10].mxu1 }
 0xa8a   :  { %v6183_v58 = vpop.f32.mrb[11].mxu1 }
 0xa8d   :  { %v4889_v51 = vpop.f32.mrb[12].mxu1 }
 0xa8e   :  { %3498 = vperm.xlu0 %5153, %v4889_v51   ;;  %v3482_v14 = vpop.f32.mrb[13].mxu1 }
 0xa8f   :  { %3493 = vperm.xlu1 %5154, %v3482_v14  }
 0xb0d   :  { %v3499_v20 = vpop.permute.xlu0 %3498 }
 0xb0e   :  { %v3503_v23 = vsub.f32 %v3401_v43, %v3499_v20  ;;  %v3504_v38 = vsub.f32 %v3403_v44, %v3499_v20  ;;  %v3494_v59 = vpop.permute.xlu1 %3493  ;;  %v6508_v20 = vld [vmem:[#allocation8_spill] sm:$0xff] }
 0xb0f   :  { %v3501_v24 = vsub.f32 %v3395_v35, %v3494_v59  ;;  %v3502_v29 = vsub.f32 %v3397_v36, %v3494_v59 }
 0xb10   :  { %v3507_v32 = vmul.f32 %v3503_v23, %v3503_v23  ;;  %v3508_v42 = vmul.f32 %v3504_v38, %v3504_v38 }
 0xb11   :  { %v3505_v10 = vmul.f32 %v3501_v24, %v3501_v24  ;;  %v3506_v22 = vmul.f32 %v3502_v29, %v3502_v29 }
 0xb12   :  { %v3512_v46 = vadd.f32 %v3508_v42, %v3507_v32  ;;  %v6509_v42 = vld [vmem:[#allocation7_spill] sm:$0xff] }
 0xb13   :  { %v3509_v55 = vadd.f32 %v3506_v22, %v3505_v10 }
 0xb14   :  { %3513 = vadd.xlane.f32.xlu0 %v3512_v46 }
 0xb15   :  { %3510 = vadd.xlane.f32.xlu1 %v3509_v55 }
 0xba1   :  { %v3514_v0 = vpop.xlane.xlu0 %3513 }
 0xba2   :  { %v3511_v6 = vpop.xlane.xlu1 %3510 }
 0xba3   :  { %v4967_v8 = vpack.c.bf16 %v3514_v0, %v3511_v6 }
 0xba5   :  { %4968 = vmatprep.subr.bf16.mxu1 %v4967_v8 }
 0xba6   :  { %4970 = vmatpush3.bf16.msra.mxu1 %v4967_v8 }
 0xba9   :  { %4895 = vmatmul.mubr.msk.f32.vlgmr.msra.gmra.mrb[14].mxu1 %vm1147_vm10, %v5596_v9 }
 0xbaa   :  { %3696 = vmatprep.mubr.f32.mxu1 %v6495_v31 }
 0xc7c   :  { %v4896_v35 = vpop.f32.mrb[14].mxu1 }
 0xc7d   :  { %v3587_v36 = vadd.f32 1e-05, %v4896_v35  ;;  %v3581_v43 = vpop.f32.mrb[15].mxu1 }
 0xc7e   :  { %v3582_v44 = vadd.f32 1e-05, %v3581_v43 }
 0xc7f   :  { %5161 = vrsqrt.f32 %v3587_v36 }
 0xc80   :  { %5163 = vrsqrt.f32 %v3582_v44 }
 0xc89   :  { %v5162_v34 = vpop.eup %5161 }
 0xc8a   :  { %v5164_v47 = vpop.eup %5163  ;;  %v3593_v54 = vmul.f32 %v5162_v34, %v5619_v7 }
 0xc8b   :  { %v3592_v28 = vmul.f32 %v5164_v47, %v6507_v2 }
 0xc8c   :  { %3601 = vperm.xlu0 %5153, %v3593_v54  }
 0xc8d   :  { %3596 = vperm.xlu1 %5154, %v3592_v28  }
 0xd0b   :  { %v3602_v60 = vpop.permute.xlu0 %3601 }
 0xd0c   :  { %v3606_v3 = vmul.f32 %v3602_v60, %v3503_v23  ;;  %v3607_v33 = vmul.f32 %v3602_v60, %v3504_v38  ;;  %v3597_v9 = vpop.permute.xlu1 %3596 }
 0xd0d   :  { %v3604_v51 = vmul.f32 %v3597_v9, %v3501_v24  ;;  %v3605_v14 = vmul.f32 %v3597_v9, %v3502_v29 }
 0xd0e   :  { %v3610_v59 = vadd.f32 %v3606_v3, %v6508_v20  ;;  %v3611_v32 = vadd.f32 %v3607_v33, %v6508_v20 }
 0xd0f   :  { %v3608_v10 = vadd.f32 %v3604_v51, %v6509_v42  ;;  %v3609_v22 = vadd.f32 %v3605_v14, %v6509_v42 }
 0xd10   :  { %v6194_v46 = vmax.f32 %v3610_v59, 0.0  ;;  %v3615_v7 = vmax.f32 %v3611_v32, 0.0 }
 0xd11   :  { %v6196_v55 = vmax.f32 %v3608_v10, 0.0  ;;  %v3613_v0 = vmax.f32 %v3609_v22, 0.0 }
 0xd12   :  { %3618 = vrot.lane.b32.xlu1 %v6194_v46, %s5178_s15 }
 0xd13   :  { %3620 = vrot.lane.b32.xlu0 %v3613_v0, %s5178_s15  ;;  %v4975_v23 = vpack.c.bf16 %v3615_v7, %v3613_v0  ;;  %v4977_v38 = vpack.c.bf16 %v6194_v46, %v6196_v55 }
 0xd16   :  { %3616 = vrot.lane.b32.xlu1 %v6196_v55, %s5178_s15 }
 0xd17   :  { %3786 = vrot.lane.b32.xlu0 %v6196_v55, %s5179_s16 }
 0xd1a   :  { %3622 = vrot.lane.b32.xlu1 %v3615_v7, %s5178_s15 }
 0xd1b   :  { %3790 = vrot.lane.b32.xlu0 %v3613_v0, %s5179_s16 }
 0xd1e   :  { %3788 = vrot.lane.b32.xlu1 %v6194_v46, %s5179_s16 }
 0xd1f   :  { %3883 = vrot.lane.b32.xlu0 %v6196_v55, %s5180_s17 }
 0xd22   :  { %3792 = vrot.lane.b32.xlu1 %v3615_v7, %s5179_s16 }
 0xd23   :  { %3887 = vrot.lane.b32.xlu0 %v3613_v0, %s5180_s17 }
 0xd26   :  { %3885 = vrot.lane.b32.xlu1 %v6194_v46, %s5180_s17 }
 0xd27   :  { %3980 = vrot.lane.b32.xlu0 %v6196_v55, %s5181_s18 }
 0xd2a   :  { %3889 = vrot.lane.b32.xlu1 %v3615_v7, %s5180_s17 }
 0xd2b   :  { %3984 = vrot.lane.b32.xlu0 %v3613_v0, %s5181_s18 }
 0xd2e   :  { %3982 = vrot.lane.b32.xlu1 %v6194_v46, %s5181_s18 }
 0xd2f   :  { %4077 = vrot.lane.b32.xlu0 %v6196_v55, %s5182_s19 }
 0xd32   :  { %3986 = vrot.lane.b32.xlu1 %v3615_v7, %s5181_s18 }
 0xd33   :  { %4081 = vrot.lane.b32.xlu0 %v3613_v0, %s5182_s19 }
 0xd36   :  { %4079 = vrot.lane.b32.xlu1 %v6194_v46, %s5182_s19 }
 0xd37   :  { %4174 = vrot.lane.b32.xlu0 %v6196_v55, %s5183_s20 }
 0xd3a   :  { %4083 = vrot.lane.b32.xlu1 %v3615_v7, %s5182_s19 }
 0xd3b   :  { %4178 = vrot.lane.b32.xlu0 %v3613_v0, %s5183_s20 }
 0xd3e   :  { %4176 = vrot.lane.b32.xlu1 %v6194_v46, %s5183_s20 }
 0xd3f   :  { %4271 = vrot.lane.b32.xlu0 %v6196_v55, %s5184_s21 }
 0xd42   :  { %4180 = vrot.lane.b32.xlu1 %v3615_v7, %s5183_s20 }
 0xd43   :  { %4275 = vrot.lane.b32.xlu0 %v3613_v0, %s5184_s21 }
 0xd46   :  { %4273 = vrot.lane.b32.xlu1 %v6194_v46, %s5184_s21 }
 0xd47   :  { %4368 = vrot.lane.b32.xlu0 %v6196_v55, %s5185_s22 }
 0xd4a   :  { %4277 = vrot.lane.b32.xlu1 %v3615_v7, %s5184_s21 }
 0xd4b   :  { %4372 = vrot.lane.b32.xlu0 %v3613_v0, %s5185_s22 }
 0xd4e   :  { %4370 = vrot.lane.b32.xlu1 %v6194_v46, %s5185_s22 }
 0xd52   :  { %4374 = vrot.lane.b32.xlu1 %v3615_v7, %s5185_s22 }
 0xd84   :  { %v3619_v24 = vpop.permute.xlu1 %3618 }
 0xd85   :  { %v3621_v29 = vpop.permute.xlu0 %3620 }
 0xd88   :  { %v3617_v6 = vpop.permute.xlu1 %3616 }
 0xd89   :  { %v3787_v8 = vpop.permute.xlu0 %3786  ;;  %v3624_v35 = vsel %vm186_vm1, %v3617_v6, %v3621_v29  ;;  %v3626_v36 = vsel %vm186_vm1, %v3621_v29, %v3617_v6 }
 0xd8a   :  { %v3628_v54 = vmul.f32 %v3626_v36, %v5299_v13  ;;  %v3629_v2 = vmul.f32 %v3624_v35, %v5296_v12 }
 0xd8c   :  { %v3623_v43 = vpop.permute.xlu1 %3622 }
 0xd8d   :  { %v3625_v44 = vsel %vm186_vm1, %v3619_v24, %v3623_v43  ;;  %v3627_v34 = vsel %vm186_vm1, %v3623_v43, %v3619_v24  ;;  %v3791_v47 = vpop.permute.xlu0 %3790 }
 0xd8e   :  { %v3630_v28 = vmul.f32 %v3627_v34, %v5299_v13  ;;  %v3631_v60 = vmul.f32 %v3625_v44, %v5296_v12  ;;  %v3794_v14 = vsel %vm375_vm2, %v3787_v8, %v3791_v47  ;;  %v3796_v10 = vsel %vm375_vm2, %v3791_v47, %v3787_v8 }
 0xd8f   :  { %v3799_v42 = vmul.f32 %v3794_v14, %v5303_v15 }
 0xd90   :  { %v4973_v3 = vpack.c.bf16 %v3630_v28, %v3628_v54  ;;  %v3789_v33 = vpop.permute.xlu1 %3788  ;;  %v4971_v9 = vpack.c.bf16 %v3631_v60, %v3629_v2 }
 0xd91   :  { %v3884_v51 = vpop.permute.xlu0 %3883 }
 0xd92   :  { %4972 = vmatprep.subr.bf16.mxu1 %v4971_v9 }
 0xd93   :  { %4974 = vmatpush1.bf16.msra.mxu1 %v4973_v3 }
 0xd94   :  { %4976 = vmatprep.subr.bf16.mxu1 %v4975_v23  ;;  %v3793_v20 = vpop.permute.xlu1 %3792 }
 0xd95   :  { %v3795_v59 = vsel %vm375_vm2, %v3789_v33, %v3793_v20  ;;  %v3888_v32 = vpop.permute.xlu0 %3887  ;;  %v3797_v12 = vsel %vm375_vm2, %v3793_v20, %v3789_v33 }
 0xd96   :  { %v3801_v13 = vmul.f32 %v3795_v59, %v5303_v15  ;;  %4797 = vmatmul.mubr.msk.f32.vlgmr.msra.gmra.mrb[16].mxu1 %vm1147_vm10, %v5723_v21  ;;  %v3800_v7 = vmul.f32 %v3797_v12, %v5327_v27  ;;  %v3798_v15 = vmul.f32 %v3796_v10, %v5327_v27  ;;  %v3891_v21 = vsel %vm485_vm4, %v3884_v51, %v3888_v32 }
 0xd97   :  { %4978 = vmatpush1.bf16.msra.mxu1 %v4977_v38  ;;  %3702 = vmatprep.mubr.f32.mxu1 %v6495_v31  ;;  %v3896_v29 = vmul.f32 %v3891_v21, %v5341_v30  ;;  %v3893_v27 = vsel %vm485_vm4, %v3888_v32, %v3884_v51 }
 0xd98   :  { %v3886_v22 = vpop.permute.xlu1 %3885  ;;  %v4979_v46 = vpack.c.bf16 %v3801_v13, %v3799_v42  ;;  %v4981_v23 = vpack.c.bf16 %v3800_v7, %v3798_v15 }
 0xd99   :  { %v3981_v55 = vpop.permute.xlu0 %3980 }
 0xd9a   :  { %4798 = vmatmul.mubr.msk.f32.gmra.mrb[18].mxu1 %vm1147_vm10, %v5742_v62  ;;  %4980 = vmatprep.subr.bf16.mxu1 %v4979_v46  ;;  %v6510_v46 = vld [vmem:[#allocation9_spill] sm:$0xff] }
 0xd9b   :  { %3773 = vmatprep.mubr.f32.mxu1 %v6495_v31 }
 0xd9c   :  { %v3890_v0 = vpop.permute.xlu1 %3889 }
 0xd9d   :  { %v3892_v38 = vsel %vm485_vm4, %v3886_v22, %v3890_v0  ;;  %v3985_v24 = vpop.permute.xlu0 %3984  ;;  %v3894_v6 = vsel %vm485_vm4, %v3890_v0, %v3886_v22 }
 0xd9e   :  { %v3898_v62 = vmul.f32 %v3892_v38, %v5341_v30  ;;  %4799 = vmatmul.mubr.msk.f32.vlgmr.msra.gmra.mrb[16].mxu1 %vm1147_vm10, %v5756_v19  ;;  %v3897_v36 = vmul.f32 %v3894_v6, %v5367_v39  ;;  %v3895_v30 = vmul.f32 %v3893_v27, %v5367_v39  ;;  %v3988_v19 = vsel %vm595_vm5, %v3981_v55, %v3985_v24 }
 0xd9f   :  { %4982 = vmatpush1.bf16.msra.mxu1 %v4981_v23  ;;  %3779 = vmatprep.mubr.f32.mxu1 %v6495_v31  ;;  %v3993_v2 = vmul.f32 %v3988_v19, %v5373_v41  ;;  %v3990_v39 = vsel %vm595_vm5, %v3985_v24, %v3981_v55  ;;  %v6511_v24 = vld [vmem:[#allocation10_spill] sm:$0xff] }
 0xda0   :  { %v3983_v8 = vpop.permute.xlu1 %3982  ;;  %v4983_v35 = vpack.c.bf16 %v3898_v62, %v3896_v29  ;;  %v4985_v34 = vpack.c.bf16 %v3897_v36, %v3895_v30 }
 0xda1   :  { %v4078_v43 = vpop.permute.xlu0 %4077 }
 0xda2   :  { %4800 = vmatmul.mubr.msk.f32.gmra.mrb[18].mxu1 %vm1147_vm10, %v5770_v56  ;;  %4984 = vmatprep.subr.bf16.mxu1 %v4983_v35 }
 0xda3   :  { %3866 = vmatprep.mubr.f32.mxu1 %v6495_v31 }
 0xda4   :  { %v3987_v44 = vpop.permute.xlu1 %3986 }
 0xda5   :  { %v3989_v47 = vsel %vm595_vm5, %v3983_v8, %v3987_v44  ;;  %v4082_v54 = vpop.permute.xlu0 %4081  ;;  %v3991_v28 = vsel %vm595_vm5, %v3987_v44, %v3983_v8  ;;  %v6512_v8 = vld [vmem:[#allocation11_spill] sm:$0xff] }
 0xda6   :  { %v3995_v56 = vmul.f32 %v3989_v47, %v5373_v41  ;;  %4801 = vmatmul.mubr.msk.f32.vlgmr.msra.gmra.mrb[16].mxu1 %vm1147_vm10, %v5785_v53  ;;  %v3994_v33 = vmul.f32 %v3991_v28, %v5399_v50  ;;  %v3992_v41 = vmul.f32 %v3990_v39, %v5399_v50  ;;  %v4087_v53 = vsel %vm705_vm6, %v4082_v54, %v4078_v43  ;;  %v6513_v47 = vld [vmem:[#allocation12_spill] sm:$0xff]  ;;  %v6514_v39 = vld [vmem:[#allocation13_spill] sm:$0xff] }
 0xda7   :  { %4986 = vmatpush1.bf16.msra.mxu1 %v4985_v34  ;;  %3872 = vmatprep.mubr.f32.mxu1 %v6495_v31  ;;  %v4090_v32 = vmul.f32 %v4087_v53, %v5405_v52  ;;  %v4085_v50 = vsel %vm705_vm6, %v4078_v43, %v4082_v54 }
 0xda8   :  { %v4080_v60 = vpop.permute.xlu1 %4079  ;;  %v4987_v3 = vpack.c.bf16 %v3995_v56, %v3993_v2  ;;  %v4989_v14 = vpack.c.bf16 %v3994_v33, %v3992_v41  ;;  %v5173_v41 = vld [vmem:[%s6459_s9 + $0x18] ss:$0 sm:$0xff] }
 0xda9   :  { %v4175_v9 = vpop.permute.xlu0 %4174 }
 0xdaa   :  { %4802 = vmatmul.mubr.msk.f32.gmra.mrb[18].mxu1 %vm1147_vm10, %v5799_v18  ;;  %4988 = vmatprep.subr.bf16.mxu1 %v4987_v3 }
 0xdab   :  { %3963 = vmatprep.mubr.f32.mxu1 %v6495_v31 }
 0xdac   :  { %v4084_v51 = vpop.permute.xlu1 %4083 }
 0xdad   :  { %v4088_v20 = vsel %vm705_vm6, %v4084_v51, %v4080_v60  ;;  %v4179_v59 = vpop.permute.xlu0 %4178  ;;  %v4086_v42 = vsel %vm705_vm6, %v4080_v60, %v4084_v51 }
 0xdae   :  { %v4092_v18 = vmul.f32 %v4088_v20, %v5405_v52  ;;  %4803 = vmatmul.mubr.msk.f32.vlgmr.msra.gmra.mrb[16].mxu1 %vm1147_vm10, %v5815_v4  ;;  %v4091_v10 = vmul.f32 %v4086_v42, %v5431_v61  ;;  %v4089_v52 = vmul.f32 %v4085_v50, %v5431_v61  ;;  %v4184_v4 = vsel %vm815_vm7, %v4179_v59, %v4175_v9 }
 0xdaf   :  { %4990 = vmatpush1.bf16.msra.mxu1 %v4989_v14  ;;  %3969 = vmatprep.mubr.f32.mxu1 %v6495_v31  ;;  %v4187_v0 = vmul.f32 %v4184_v4, %v5437_v63  ;;  %v4182_v61 = vsel %vm815_vm7, %v4175_v9, %v4179_v59 }
 0xdb0   :  { %v4177_v12 = vpop.permute.xlu1 %4176  ;;  %v4991_v13 = vpack.c.bf16 %v4092_v18, %v4090_v32  ;;  %v4993_v55 = vpack.c.bf16 %v4091_v10, %v4089_v52  ;;  %v5174_v32 = vld [vmem:[%s6459_s9 + $0x10] ss:$0 sm:$0xff]  ;;  %v6516_v18 = vld [vmem:[#allocation15_spill] sm:$0xff]  ;;  %v6519_v10 = vld [vmem:[#allocation18_spill] sm:$0xff] }
 0xdb1   :  { %v4272_v22 = vpop.permute.xlu0 %4271 }
 0xdb2   :  { %4804 = vmatmul.mubr.msk.f32.gmra.mrb[18].mxu1 %vm1147_vm10, %v6510_v46  ;;  %4992 = vmatprep.subr.bf16.mxu1 %v4991_v13  ;;  %v6517_v13 = vld [vmem:[#allocation16_spill] sm:$0xff] }
 0xdb3   :  { %4060 = vmatprep.mubr.f32.mxu1 %v6495_v31 }
 0xdb4   :  { %v4181_v7 = vpop.permute.xlu1 %4180 }
 0xdb5   :  { %v4185_v15 = vsel %vm815_vm7, %v4181_v7, %v4177_v12  ;;  %v4276_v21 = vpop.permute.xlu0 %4275  ;;  %v4183_v23 = vsel %vm815_vm7, %v4177_v12, %v4181_v7 }
 0xdb6   :  { %v4189_v38 = vmul.f32 %v4185_v15, %v5437_v63  ;;  %4805 = vmatmul.mubr.msk.f32.vlgmr.msra.gmra.mrb[16].mxu1 %vm1147_vm10, %v6511_v24  ;;  %v4188_v62 = vmul.f32 %v4183_v23, %v5463_v16  ;;  %v4186_v63 = vmul.f32 %v4182_v61, %v5463_v16  ;;  %v4281_v35 = vsel %vm925_vm8, %v4276_v21, %v4272_v22 }
 0xdb7   :  { %4994 = vmatpush1.bf16.msra.mxu1 %v4993_v55  ;;  %4066 = vmatprep.mubr.f32.mxu1 %v6495_v31  ;;  %v4284_v19 = vmul.f32 %v4281_v35, %v5469_v17  ;;  %v4279_v16 = vsel %vm925_vm8, %v4272_v22, %v4276_v21  ;;  %v6520_v22 = vld [vmem:[#allocation19_spill] sm:$0xff] }
 0xdb8   :  { %v4274_v29 = vpop.permute.xlu1 %4273  ;;  %v4995_v6 = vpack.c.bf16 %v4189_v38, %v4187_v0  ;;  %v4997_v43 = vpack.c.bf16 %v4188_v62, %v4186_v63  ;;  %v5176_v38 = vld [vmem:[%s6462_s4] sm:$0xff] }
 0xdb9   :  { %v4369_v27 = vpop.permute.xlu0 %4368 }
 0xdba   :  { %4806 = vmatmul.mubr.msk.f32.gmra.mrb[18].mxu1 %vm1147_vm10, %v6512_v8  ;;  %4996 = vmatprep.subr.bf16.mxu1 %v4995_v6 }
 0xdbb   :  { %4157 = vmatprep.mubr.f32.mxu1 %v6495_v31 }
 0xdbc   :  { %v4278_v36 = vpop.permute.xlu1 %4277 }
 0xdbd   :  { %v4282_v30 = vsel %vm925_vm8, %v4278_v36, %v4274_v29  ;;  %v4280_v44 = vsel %vm925_vm8, %v4274_v29, %v4278_v36  ;;  %v4373_v54 = vpop.permute.xlu0 %4372 }
 0xdbe   :  { %v4286_v34 = vmul.f32 %v4282_v30, %v5469_v17  ;;  %4807 = vmatmul.mubr.msk.f32.vlgmr.msra.gmra.mrb[16].mxu1 %vm1147_vm10, %v6513_v47  ;;  %v4285_v56 = vmul.f32 %v4280_v44, %v5494_v25  ;;  %v4283_v17 = vmul.f32 %v4279_v16, %v5494_v25  ;;  %v4378_v60 = vsel %vm1035_vm9, %v4373_v54, %v4369_v27  ;;  %v6515_v25 = vld [vmem:[#allocation14_spill] sm:$0xff] }
 0xdbf   :  { %4998 = vmatpush1.bf16.msra.mxu1 %v4997_v43  ;;  %4163 = vmatprep.mubr.f32.mxu1 %v6495_v31  ;;  %v4381_v53 = vmul.f32 %v5173_v41, %v4378_v60  ;;  %v4376_v20 = vsel %vm1035_vm9, %v4369_v27, %v4373_v54  ;;  %v2439_v47 = vadd.f32 1e-05, %v6175_v37  ;;  %v46_v54 = vld [vmem:[%s6466_s7 + $0x8] sm:$0xff] }
 0xdc0   :  { %v4371_v2 = vpop.permute.xlu1 %4370  ;;  %v4999_v28 = vpack.c.bf16 %v4286_v34, %v4284_v19  ;;  %v5001_v33 = vpack.c.bf16 %v4285_v56, %v4283_v17  ;;  %v4380_v50 = vmul.f32 %v5174_v32, %v4376_v20  ;;  %v2444_v19 = vadd.f32 1e-05, %v6173_v40  ;;  %v45_v40 = vld [vmem:[%s6466_s7] sm:$0xff] }
 0xdc1   :  { %v47_v20 = vld [vmem:[%s6467_s8] sm:$0xff] }
 0xdc2   :  { %4808 = vmatmul.mubr.msk.f32.gmra.mrb[18].mxu1 %vm1147_vm10, %v6514_v39  ;;  %5000 = vmatprep.subr.bf16.mxu1 %v4999_v28  ;;  %5165 = vrsqrt.f32 %v2444_v19 }
 0xdc3   :  { %4254 = vmatprep.mubr.f32.mxu1 %v6495_v31  ;;  %5167 = vrsqrt.f32 %v2439_v47 }
 0xdc4   :  { %v4375_v3 = vpop.permute.xlu1 %4374 }
 0xdc5   :  { %v4379_v9 = vsel %vm1035_vm9, %v4375_v3, %v4371_v2  ;;  %v4377_v51 = vsel %vm1035_vm9, %v4371_v2, %v4375_v3 }
 0xdc6   :  { %v4383_v14 = vmul.f32 %v5173_v41, %v4379_v9  ;;  %4809 = vmatmul.mubr.msk.f32.vlgmr.msra.gmra.mrb[16].mxu1 %vm1147_vm10, %v6515_v25  ;;  %v4382_v42 = vmul.f32 %v5174_v32, %v4377_v51  ;;  %v48_v25 = vld [vmem:[%s6467_s8 + $0x8] sm:$0xff] }
 0xdc7   :  { %5002 = vmatpush1.bf16.msra.mxu1 %v5001_v33  ;;  %4260 = vmatprep.mubr.f32.mxu1 %v6495_v31 }
 0xdc8   :  { %v5003_v59 = vpack.c.bf16 %v4383_v14, %v4381_v53  ;;  %v5005_v12 = vpack.c.bf16 %v4382_v42, %v4380_v50 }
 0xdca   :  { %4810 = vmatmul.mubr.msk.f32.gmra.mrb[18].mxu1 %vm1147_vm10, %v6516_v18  ;;  %5004 = vmatprep.subr.bf16.mxu1 %v5003_v59 }
 0xdcb   :  { %4351 = vmatprep.mubr.f32.mxu1 %v6495_v31 }
 0xdcc   :  { %v5166_v16 = vpop.eup %5165 }
 0xdcd   :  { %v2450_v2 = vmul.f32 %v5166_v16, %v46_v54  ;;  %v5168_v28 = vpop.eup %5167 }
 0xdce   :  { %4811 = vmatmul.mubr.msk.f32.vlgmr.msra.gmra.mrb[16].mxu1 %vm1147_vm10, %v6517_v13  ;;  %v2449_v56 = vmul.f32 %v5168_v28, %v45_v40 }
 0xdcf   :  { %5006 = vmatpush1.bf16.msra.mxu1 %v5005_v12  ;;  %4357 = vmatprep.mubr.f32.mxu1 %v6495_v31 }
 0xdd2   :  { %4812 = vmatmul.mubr.msk.f32.gmra.mrb[18].mxu1 %vm1147_vm10, %v6518_v5 }
 0xdd3   :  { %4448 = vmatprep.mubr.f32.mxu1 %v6495_v31 }
 0xdd6   :  { %4813 = vmatmul.mubr.msk.f32.vlgmr.msra.gmra.mrb[16].mxu1 %vm1147_vm10, %v6519_v10 }
 0xdd7   :  { %4454 = vmatprep.mubr.f32.mxu1 %v6495_v31  ;;  %v5175_v31 = vld [vmem:[%s6462_s4 + $0x8] sm:$0xff] }
 0xdda   :  { %4814 = vmatmul.mubr.msk.f32.gmra.mrb[18].mxu1 %vm1147_vm10, %v6520_v22 }
 0xea9   :  { %v4450_v46 = vpop.f32.mrb[16].mxu1 }
 0xeaa   :  { %v4452_v52 = vpop.f32.mrb[17].mxu1 }
 0xeab   :  { %v4465_v4 = vadd.f32 %v4452_v52, %v4450_v46 }
 0xead   :  { %4466 = vadd.xlane.f32.xlu0 %v4465_v4  ;;  %v4456_v7 = vpop.f32.mrb[18].mxu1 }
 0xeae   :  { %v4458_v55 = vpop.f32.mrb[19].mxu1 }
 0xeaf   :  { %v4468_v15 = vadd.f32 %v4458_v55, %v4456_v7 }
 0xeb1   :  { %4469 = vadd.xlane.f32.xlu1 %v4468_v15 }
 0xf3a   :  { %v4467_v21 = vpop.xlane.xlu0 %4466 }
 0xf3e   :  { %v4470_v0 = vpop.xlane.xlu1 %4469 }
 0xf3f   :  { %v5007_v23 = vpack.c.bf16 %v4470_v0, %v4467_v21 }
 0xf41   :  { %5008 = vmatprep.subr.bf16.mxu0 %v5007_v23 }
 0xf42   :  { %5010 = vmatpush3.bf16.msra.mxu0 %v5007_v23 }
 0xf45   :  { %4902 = vmatmul.mubr.msk.f32.vlgmr.msra.gmra.mrb[16].mxu0 %vm1147_vm10, %v5175_v31 }
 0xf46   :  { %4908 = vmatprep.mubr.msk.f32.mxu0 %vm1147_vm10, %v5176_v38 }
0x1018   :  { %v4903_v24 = vpop.f32.mrb[16].mxu0 }
0x1019   :  { %4553 = vperm.xlu1 %5154, %v4903_v24   ;;  %v4537_v61 = vpop.f32.mrb[17].mxu0  ;;  %v6521_v24 = vld [vmem:[#allocation4_spill] sm:$0xff] }
0x101a   :  { %4548 = vperm.xlu0 %5153, %v4537_v61   ;;  %v6522_v61 = vld [vmem:[#allocation5_spill] sm:$0xff] }
0x1098   :  { %v4554_v29 = vpop.permute.xlu1 %4553 }
0x1099   :  { %v4558_v6 = vsub.f32 %v4456_v7, %v4554_v29  ;;  %v4559_v62 = vsub.f32 %v4458_v55, %v4554_v29  ;;  %v4549_v27 = vpop.permute.xlu0 %4548 }
0x109a   :  { %v4556_v8 = vsub.f32 %v4450_v46, %v4549_v27  ;;  %v4557_v63 = vsub.f32 %v4452_v52, %v4549_v27  ;;  %v6524_v27 = vld [vmem:[#allocation3_spill] sm:$0xff] }
0x109b   :  { %v4562_v35 = vmul.f32 %v4558_v6, %v4558_v6  ;;  %v4563_v36 = vmul.f32 %v4559_v62, %v4559_v62 }
0x109c   :  { %v4560_v43 = vmul.f32 %v4556_v8, %v4556_v8  ;;  %v4561_v30 = vmul.f32 %v4557_v63, %v4557_v63 }
0x109d   :  { %v4567_v44 = vadd.f32 %v4563_v36, %v4562_v35 }
0x109e   :  { %v4564_v34 = vadd.f32 %v4561_v30, %v4560_v43 }
0x109f   :  { %4568 = vadd.xlane.f32.xlu1 %v4567_v44 }
0x10a0   :  { %4565 = vadd.xlane.f32.xlu0 %v4564_v34 }
0x10b0   :  { %2458 = vperm.xlu1 %5154, %v2450_v2  }
0x10b6   :  { %2453 = vperm.xlu0 %5153, %v2449_v56  }
0x112c   :  { %v4569_v39 = vpop.xlane.xlu1 %4568 }
0x112d   :  { %v4566_v17 = vpop.xlane.xlu0 %4565 }
0x112e   :  { %v5011_v60 = vpack.c.bf16 %v4569_v39, %v4566_v17 }
0x1130   :  { %5012 = vmatprep.subr.bf16.mxu0 %v5011_v60  ;;  %v2459_v59 = vpop.permute.xlu1 %2458 }
0x1131   :  { %5014 = vmatpush3.bf16.msra.mxu0 %v5011_v60  ;;  %v2463_v50 = vmul.f32 %v2459_v59, %v6136_v45  ;;  %v2464_v12 = vmul.f32 %v2459_v59, %v6139_v26 }
0x1134   :  { %4909 = vmatmul.mubr.msk.f32.vlgmr.msra.gmra.mrb[18].mxu0 %vm1147_vm10, %v5175_v31 }
0x1135   :  { %v2454_v32 = vpop.permute.xlu0 %2453 }
0x1136   :  { %v2461_v10 = vmul.f32 %v2454_v32, %v6142_v11  ;;  %v2462_v22 = vmul.f32 %v2454_v32, %v6145_v49 }
0x1207   :  { %v4910_v37 = vpop.f32.mrb[18].mxu0 }
0x1208   :  { %v4642_v3 = vadd.f32 1e-05, %v4910_v37  ;;  %v4636_v33 = vpop.f32.mrb[19].mxu0 }
0x1209   :  { %v4637_v9 = vadd.f32 1e-05, %v4636_v33 }
0x120a   :  { %5169 = vrsqrt.f32 %v4642_v3 }
0x120b   :  { %5171 = vrsqrt.f32 %v4637_v9 }
0x1214   :  { %v5170_v41 = vpop.eup %5169 }
0x1215   :  { %v5172_v53 = vpop.eup %5171  ;;  %v4648_v51 = vmul.f32 %v5170_v41, %v46_v54 }
0x1216   :  { %v4647_v14 = vmul.f32 %v5172_v53, %v45_v40 }
0x1217   :  { %4656 = vperm.xlu1 %5154, %v4648_v51  }
0x1218   :  { %4651 = vperm.xlu0 %5153, %v4647_v14  }
0x121b   :  { %2472 = vperm.xlu1 %5154, %v48_v25  }
0x121c   :  { %2467 = vperm.xlu0 %5153, %v47_v20  }
0x1296   :  { %v4657_v42 = vpop.permute.xlu1 %4656 }
0x1297   :  { %v4652_v18 = vpop.permute.xlu0 %4651  ;;  %v4661_v13 = vmul.f32 %v4657_v42, %v4558_v6  ;;  %v4662_v5 = vmul.f32 %v4657_v42, %v4559_v62  ;;  %v6523_v6 = vld [vmem:[#allocation2_spill] sm:$0xff] }
0x1298   :  { %v4659_v46 = vmul.f32 %v4652_v18, %v4556_v8  ;;  %v4660_v52 = vmul.f32 %v4652_v18, %v4557_v63 }
0x129a   :  { %v2473_v4 = vpop.permute.xlu1 %2472 }
0x129b   :  { %v2477_v7 = vadd.f32 %v2473_v4, %v2463_v50  ;;  %v2478_v55 = vadd.f32 %v2473_v4, %v2464_v12  ;;  %v4665_v15 = vadd.f32 %v4661_v13, %v2473_v4  ;;  %v4666_v21 = vadd.f32 %v4662_v5, %v2473_v4  ;;  %v2468_v0 = vpop.permute.xlu0 %2467 }
0x129c   :  { %v2475_v23 = vadd.f32 %v2468_v0, %v2461_v10  ;;  %v2476_v31 = vadd.f32 %v2468_v0, %v2462_v22  ;;  %v4663_v38 = vadd.f32 %v4659_v46, %v2468_v0  ;;  %v4664_v45 = vadd.f32 %v4660_v52, %v2468_v0 }
0x129d   :  { %v2481_v26 = vadd.f32 %v2477_v7, %v6521_v24  ;;  %v2482_v29 = vadd.f32 %v2478_v55, %v6522_v61  ;;  %v4669_v11 = vadd.f32 %v4665_v15, %v6181_v1  ;;  %v4670_v49 = vadd.f32 %v4666_v21, %v6183_v58 }
0x129e   :  { %v2479_v62 = vadd.f32 %v2475_v23, %v6523_v6  ;;  %v2480_v8 = vadd.f32 %v2476_v31, %v6524_v27  ;;  %v4667_v63 = vadd.f32 %v4663_v38, %v6177_v57  ;;  %v4668_v35 = vadd.f32 %v4664_v45, %v6179_v48 }
0x129f   :  { %v2485_v36 = vmax.f32 %v2481_v26, 0.0  ;;  %v2486_v43 = vmax.f32 %v2482_v29, 0.0  ;;  %v4673_v30 = vmax.f32 %v4669_v11, 0.0  ;;  %v4674_v19 = vmax.f32 %v4670_v49, 0.0 }
0x12a0   :  { %v2483_v44 = vmax.f32 %v2479_v62, 0.0  ;;  %v2484_v34 = vmax.f32 %v2480_v8, 0.0  ;;  %v4671_v47 = vmax.f32 %v4667_v63, 0.0  ;;  %v4672_v16 = vmax.f32 %v4668_v35, 0.0 }
0x12a1   :  { %2489 = vst [vmem:[%s6468_s10 + $0x10] sm:$0xff] %v2485_v36  ;;  %2490 = vst [vmem:[%s6468_s10 + $0x18] sm:$0xff] %v2486_v43 }
0x12a2   :  { %4821 = vst [vmem:[%s6468_s10 + $0x30] sm:$0xff] %v4673_v30  ;;  %4822 = vst [vmem:[%s6468_s10 + $0x38] sm:$0xff] %v4674_v19 }
0x12a3   :  { %2487 = vst [vmem:[%s6468_s10] sm:$0xff] %v2483_v44  ;;  %2488 = vst [vmem:[%s6468_s10 + $0x8] sm:$0xff] %v2484_v34 }
0x12a4   :  { %4819 = vst [vmem:[%s6468_s10 + $0x20] sm:$0xff] %v4671_v47  ;;  %4820 = vst [vmem:[%s6468_s10 + $0x28] sm:$0xff] %v4672_v16 }

</bundles_post_ra>
